<compile_context>
chip_gen: v7x
topology: tpu7x:2x2x1
jax: 0.10.0
libtpu: 0.0.40
codegen_flags: <defaults>
</compile_context>

<pallas_src>
import functools
import math

import jax
import jax.numpy as jnp
from jax import lax
from jax.experimental import pallas as pl
from jax.experimental.pallas import tpu as pltpu

# bf16 matmuls (f32 accumulation) run the MXU at its native rate on v5e/v6e/v7x and
# halve weight HBM/VMEM bytes.  Weights are stored in PARAM_DTYPE by prepare().
MATMUL_DTYPE = jnp.bfloat16
PARAM_DTYPE = jnp.bfloat16


# ----------------------------- small utilities -----------------------------

@functools.lru_cache(maxsize=None)
def _vmem_limit_bytes():
    """Raise the scoped-VMEM limit above the 16/32 MiB defaults (v5e/v6e/v7x) so the
    resident bf16 weight slabs fit; cap at 3/4 of physical VMEM (v7x has only 64 MiB)."""
    try:
        cap = int(pltpu.get_tpu_info().vmem_capacity_bytes)
    except Exception:
        cap = 64 * 1024 * 1024
    return int(min(96 * 1024 * 1024, (cap * 3) // 4))


def _probe_copy_kernel(x_ref, o_ref):
    o_ref[...] = x_ref[...]


@functools.lru_cache(maxsize=None)
def _single_buffer_supported():
    """True iff this JAX/Mosaic supports pipeline_mode=pl.Buffered(1) on a BlockSpec
    (used to stop double-buffering grid-invariant weight operands)."""
    try:
        spec = pl.BlockSpec((8, 128), lambda i: (0, 0),
                            pipeline_mode=pl.Buffered(buffer_count=1))
        fn = pl.pallas_call(
            _probe_copy_kernel,
            out_shape=jax.ShapeDtypeStruct((8, 128), jnp.float32),
            grid=(1,),
            in_specs=[spec],
            out_specs=pl.BlockSpec((8, 128), lambda i: (0, 0)))
        jax.block_until_ready(fn(jnp.zeros((8, 128), jnp.float32)))
        return True
    except Exception:
        return False


def _const_spec(shape, index_map):
    """BlockSpec for a grid-invariant operand (weights / biases / gamma / beta):
    single-buffered so the big weight tiles are not double-buffered for nothing."""
    if _single_buffer_supported():
        return pl.BlockSpec(shape, index_map, pipeline_mode=pl.Buffered(buffer_count=1))
    return pl.BlockSpec(shape, index_map)


def _cost(flops, transcendentals, args, out_bytes):
    bytes_accessed = int(sum(int(a.size) * a.dtype.itemsize for a in args) + out_bytes)
    return pl.CostEstimate(flops=int(flops), transcendentals=int(transcendentals),
                           bytes_accessed=bytes_accessed)


# ----------------------------- in-kernel helpers -----------------------------

def _residual_layernorm(y, residual, g_ref, b_ref, eps):
    """LayerNorm(y + residual) * gamma + beta, statistics in f32."""
    x = (y + residual).astype(jnp.float32)
    mean = jnp.mean(x, axis=-1, keepdims=True)
    var = jnp.mean((x - mean) ** 2, axis=-1, keepdims=True)
    n = (x - mean) * lax.rsqrt(var + eps)
    return n * g_ref[...] + b_ref[...]


# ----------------------------- Pallas kernels -----------------------------

def _attn_ln_kernel(*refs, n_head, scale, eps, has_mask):
    """Q proj (row tile) + K/V proj (full kv) -> per-head softmax(QK^T)V -> dense output
    projection -> residual add -> LayerNorm, on the current (batch, q-row-tile)."""
    if has_mask:
        (q_ref, kv_ref, wq_ref, bq_ref, wkv_ref, bkv_ref, wo_ref, bo_ref,
         mask_ref, g_ref, b_ref, o_ref) = refs
        # hoisted out of the head loop: ONE (tq, Sk) VPU multiply per grid step
        mask_neg = mask_ref[...].astype(jnp.float32) * (-1e9)
    else:
        (q_ref, kv_ref, wq_ref, bq_ref, wkv_ref, bkv_ref, wo_ref, bo_ref,
         g_ref, b_ref, o_ref) = refs
        mask_neg = None

    q_in = q_ref[0]                                  # (tq, D) activations (f32)
    kv_in = kv_ref[0]                                # (Sk, D)
    d = q_in.shape[-1]
    hd = d // n_head

    q_p = jnp.dot(q_in.astype(MATMUL_DTYPE), wq_ref[...].astype(MATMUL_DTYPE),
                  preferred_element_type=jnp.float32) + bq_ref[...]
    kv = jnp.dot(kv_in.astype(MATMUL_DTYPE), wkv_ref[...].astype(MATMUL_DTYPE),
                 preferred_element_type=jnp.float32) + bkv_ref[...]
    k_p, v_p = kv[:, :d], kv[:, d:]

    # Per-head attention.  The per-head contexts are concatenated back into a single
    # lane-dense (tq, D) slab (one cheap XLU concat) so the output projection is ONE
    # dense (tq,D)@(D,D) MXU matmul instead of n_head K=head_dim matmuls (which would
    # leave the 256-deep MXUs on v6e/v7x at ~25% utilization).
    ctx = []
    for h in range(n_head):
        sl = slice(h * hd, (h + 1) * hd)
        s = lax.dot_general(q_p[:, sl].astype(MATMUL_DTYPE),
                            k_p[:, sl].astype(MATMUL_DTYPE),
                            (((1,), (1,)), ((), ())),        # contract last dims, no K^T
                            preferred_element_type=jnp.float32)
        if mask_neg is not None:
            s = s + mask_neg                 # PyTorch order: mask first ...
        s = s * scale                        # ... then divide by sqrt(model_dim)
        s = s - jnp.max(s, axis=-1, keepdims=True)
        p = jnp.exp(s)
        p = p * pl.reciprocal(jnp.sum(p, axis=-1, keepdims=True), approx=True)
        ctx.append(jnp.dot(p.astype(MATMUL_DTYPE), v_p[:, sl].astype(MATMUL_DTYPE),
                           preferred_element_type=jnp.float32))
    ctx = jnp.concatenate(ctx, axis=-1)      # (tq, D)

    attn = jnp.dot(ctx.astype(MATMUL_DTYPE), wo_ref[...].astype(MATMUL_DTYPE),
                   preferred_element_type=jnp.float32) + bo_ref[...]
    o_ref[0] = _residual_layernorm(attn, q_in.astype(jnp.float32),
                                   g_ref, b_ref, eps).astype(o_ref.dtype)


def _ffn_ln_kernel(x_ref, w1_ref, b1_ref, w2_ref, b2_ref, g_ref, beta_ref, o_ref,
                   acc_ref, *, eps):
    """FD-tiled Linear->ReLU->Linear with f32 accumulator; residual+LN on last FD tile."""
    j = pl.program_id(1)

    @pl.when(j == 0)
    def _():
        acc_ref[...] = jnp.zeros_like(acc_ref)

    x = x_ref[...]                                   # (tr, D)
    h = jnp.dot(x.astype(MATMUL_DTYPE), w1_ref[...].astype(MATMUL_DTYPE),
                preferred_element_type=jnp.float32) + b1_ref[...]
    h = jnp.maximum(h, 0.0)                          # ReLU is exact per FD tile
    acc_ref[...] += jnp.dot(h.astype(MATMUL_DTYPE), w2_ref[...].astype(MATMUL_DTYPE),
                            preferred_element_type=jnp.float32)

    @pl.when(j == pl.num_programs(1) - 1)
    def _():
        y = acc_ref[...] + b2_ref[...]
        o_ref[...] = _residual_layernorm(y, x_ref[...].astype(jnp.float32),
                                         g_ref, beta_ref, eps).astype(o_ref.dtype)


def _head_kernel(x_ref, w1_ref, b1_ref, w2_ref, b2_ref, o_ref, h_ref):
    # fc_out1 + ReLU computed once per row tile (vocab axis j == 0), cached in VMEM in
    # MATMUL_DTYPE so the vocab-tiled fc_out2 reuses it with no per-tile cast.
    @pl.when(pl.program_id(1) == 0)
    def _():
        h = jnp.dot(x_ref[...].astype(MATMUL_DTYPE), w1_ref[...].astype(MATMUL_DTYPE),
                    preferred_element_type=jnp.float32) + b1_ref[...]
        h_ref[...] = jnp.maximum(h, 0.0).astype(h_ref.dtype)
    y = jnp.dot(h_ref[...], w2_ref[...].astype(MATMUL_DTYPE),
                preferred_element_type=jnp.float32) + b2_ref[...]
    o_ref[...] = y.astype(o_ref.dtype)


# ----------------------------- wrappers -----------------------------

def fused_attention_ln_block(q, kv, p, gamma, beta, mask, n_head, model_dim,
                             *, eps=1e-5, q_tile=256):
    """LayerNorm(MultiHead(q, kv, kv, mask) + q) in ONE pallas_call.

    Grid = (batch, q-row-tiles), both "parallel" so small-batch OCR decode still keeps
    both v7x TensorCores busy.  The K/V projection is recomputed per q tile, which only
    costs anything when Sq > q_tile."""
    B, Sq, D = q.shape
    Sk = kv.shape[1]
    scale = 1.0 / math.sqrt(model_dim)
    has_mask = mask is not None
    tq = Sq if Sq <= q_tile else q_tile
    nq = pl.cdiv(Sq, tq)

    in_specs = [
        pl.BlockSpec((1, tq, D), lambda b, i: (b, i, 0)),     # q rows (also residual)
        pl.BlockSpec((1, Sk, D), lambda b, i: (b, 0, 0)),     # full kv sequence
        _const_spec((D, D), lambda b, i: (0, 0)),             # wq
        _const_spec((1, D), lambda b, i: (0, 0)),             # bq
        _const_spec((D, 2 * D), lambda b, i: (0, 0)),         # wkv (pre-concatenated)
        _const_spec((1, 2 * D), lambda b, i: (0, 0)),         # bkv
        _const_spec((D, D), lambda b, i: (0, 0)),             # wo
        _const_spec((1, D), lambda b, i: (0, 0)),             # bo
    ]
    args = [q, kv, p["wq_w"], p["wq_b"], p["wkv_w"], p["wkv_b"], p["wo_w"], p["wo_b"]]
    if has_mask:
        in_specs.append(pl.BlockSpec((tq, Sk), lambda b, i: (i, 0)))
        args.append(mask)
    in_specs += [_const_spec((1, D), lambda b, i: (0, 0)),    # gamma
                 _const_spec((1, D), lambda b, i: (0, 0))]    # beta
    args += [gamma, beta]

    flops = (2 * B * Sq * D * D                 # Q projection
             + 2 * B * nq * Sk * D * 2 * D      # K/V projection (recomputed per q tile)
             + 4 * B * Sq * Sk * D              # QK^T + PV
             + 2 * B * Sq * D * D)              # dense output projection
    cost = _cost(flops, B * n_head * Sq * Sk, args, B * Sq * D * 4)

    return pl.pallas_call(
        functools.partial(_attn_ln_kernel, n_head=n_head, scale=scale, eps=eps,
                          has_mask=has_mask),
        out_shape=jax.ShapeDtypeStruct((B, Sq, D), q.dtype),
        grid=(B, nq),
        in_specs=in_specs,
        out_specs=pl.BlockSpec((1, tq, D), lambda b, i: (b, i, 0)),
        compiler_params=pltpu.CompilerParams(
            dimension_semantics=("parallel", "parallel"),
            vmem_limit_bytes=_vmem_limit_bytes()),
        cost_estimate=cost,
    )(*args)


def fused_ffn_block(x, w1, b1, w2, b2, gamma, beta, *, eps=1e-5,
                    row_tile=512, fd_tile=2048):
    """LayerNorm(Linear(ReLU(Linear(x))) + x) in ONE pallas_call.

    Rows "parallel" x hidden(FD) tiles "arbitrary" with a (tr, D) f32 accumulator, so
    the full (D,FD)/(FD,D) weights never have to be VMEM-resident at once (required for
    v7x's 64 MiB VMEM at real TrOCR dims)."""
    B, S, D = x.shape
    FD = w1.shape[1]
    xf = x.reshape(B * S, D)
    n = B * S
    tr = n if n <= row_tile else row_tile
    # only tile FD when it divides evenly (padded reduction columns would corrupt acc)
    tfd = fd_tile if (FD > fd_tile and FD % fd_tile == 0) else FD
    nfd = FD // tfd

    args = [xf, w1, b1, w2, b2, gamma, beta]
    cost = _cost(4 * n * D * FD, 0, args, n * D * 4)

    out = pl.pallas_call(
        functools.partial(_ffn_ln_kernel, eps=eps),
        out_shape=jax.ShapeDtypeStruct((n, D), x.dtype),
        grid=(pl.cdiv(n, tr), nfd),
        in_specs=[
            pl.BlockSpec((tr, D), lambda i, j: (i, 0)),
            pl.BlockSpec((D, tfd), lambda i, j: (0, j)),      # w1 tile streams over FD
            pl.BlockSpec((1, tfd), lambda i, j: (0, j)),
            pl.BlockSpec((tfd, D), lambda i, j: (j, 0)),      # w2 tile streams over FD
            _const_spec((1, D), lambda i, j: (0, 0)),         # b2
            _const_spec((1, D), lambda i, j: (0, 0)),         # gamma
            _const_spec((1, D), lambda i, j: (0, 0)),         # beta
        ],
        out_specs=pl.BlockSpec((tr, D), lambda i, j: (i, 0)),
        scratch_shapes=[pltpu.VMEM((tr, D), jnp.float32)],
        compiler_params=pltpu.CompilerParams(
            dimension_semantics=("parallel", "arbitrary"),
            vmem_limit_bytes=_vmem_limit_bytes()),
        cost_estimate=cost,
    )(*args)
    return out.reshape(B, S, D)


def decoder_head(x, w1, b1, w2, b2, *, row_tile=512, vocab_tile=1024):
    """fc_out1 -> ReLU -> fc_out2 in ONE pallas_call, rows "parallel" x vocab "arbitrary".

    The fc_out1 activation is computed once per row tile and cached (bf16) in a VMEM
    scratch so the vocab-tiled fc_out2 reuses it.  bf16 fc2_w + larger row_tile halve the
    HBM streaming of the (D,V) weight (the roofline on v5e/v6e at real vocab sizes).
    NOTE: pad V to a multiple of 128 at real dims to avoid masked stores on the last
    vocab tile; keep vocab_tile <= 1024 on v7x (64 MiB VMEM)."""
    B, S, D = x.shape
    V = w2.shape[1]
    xf = x.reshape(B * S, D)
    n = B * S
    tr = n if n <= row_tile else row_tile
    tv = V if V <= vocab_tile else vocab_tile

    args = [xf, w1, b1, w2, b2]
    cost = _cost(2 * n * D * D + 2 * n * D * V, 0, args, n * V * 4)

    out = pl.pallas_call(
        _head_kernel,
        out_shape=jax.ShapeDtypeStruct((n, V), x.dtype),
        grid=(pl.cdiv(n, tr), pl.cdiv(V, tv)),
        in_specs=[
            pl.BlockSpec((tr, D), lambda i, j: (i, 0)),
            _const_spec((D, D), lambda i, j: (0, 0)),         # fc1 weight: grid-invariant
            _const_spec((1, D), lambda i, j: (0, 0)),
            pl.BlockSpec((D, tv), lambda i, j: (0, j)),       # fc2 weight: streams vocab
            pl.BlockSpec((1, tv), lambda i, j: (0, j)),
        ],
        out_specs=pl.BlockSpec((tr, tv), lambda i, j: (i, j)),
        scratch_shapes=[pltpu.VMEM((tr, D), MATMUL_DTYPE)],
        compiler_params=pltpu.CompilerParams(
            dimension_semantics=("parallel", "arbitrary"),
            vmem_limit_bytes=_vmem_limit_bytes()),
        cost_estimate=cost,
    )(*args)
    return out.reshape(B, S, V)


# ----------------------------- module forward -----------------------------

def decoder_block(p, x, enc_out, trg_mask, src_mask, n_head, model_dim):
    query = fused_attention_ln_block(x, x, p["self_attn"], p["norm_g"], p["norm_b"],
                                     trg_mask, n_head, model_dim)
    x2 = fused_attention_ln_block(query, enc_out, p["cross_attn"],
                                  p["norm1_g"], p["norm1_b"], src_mask,
                                  n_head, model_dim)
    return fused_ffn_block(x2, p["ff1_w"], p["ff1_b"], p["ff2_w"], p["ff2_b"],
                           p["norm2_g"], p["norm2_b"])


def decoder_forward(params, x, enc_out, trg_mask, src_mask, n_head, model_dim):
    for lp in params["layers"]:
        x = decoder_block(lp, x, enc_out, trg_mask, src_mask, n_head, model_dim)
    return decoder_head(x, params["fc1_w"], params["fc1_b"],
                        params["fc2_w"], params["fc2_b"])


# ----------------------------- parameter prep -----------------------------

def prepare_decoder_params(raw, param_dtype=PARAM_DTYPE):
    """One-time packing (NOT per forward call): concatenate K/V projection weights,
    reshape biases/norm params to (1, N) f32, cast matmul weights to bf16."""
    f32row = lambda a: a.reshape(1, -1).astype(jnp.float32)

    def pack_mha(p):
        return dict(
            wq_w=p["wq_w"].astype(param_dtype),
            wq_b=f32row(p["wq_b"]),
            wkv_w=jnp.concatenate([p["wk_w"], p["wv_w"]], axis=1).astype(param_dtype),
            wkv_b=f32row(jnp.concatenate([p["wk_b"], p["wv_b"]])),
            wo_w=p["wo_w"].astype(param_dtype),
            wo_b=f32row(p["wo_b"]),
        )

    layers = []
    for lp in raw["layers"]:
        layers.append(dict(
            self_attn=pack_mha(lp["self_attn"]),
            cross_attn=pack_mha(lp["cross_attn"]),
            norm_g=f32row(lp["norm_g"]), norm_b=f32row(lp["norm_b"]),
            norm1_g=f32row(lp["norm1_g"]), norm1_b=f32row(lp["norm1_b"]),
            norm2_g=f32row(lp["norm2_g"]), norm2_b=f32row(lp["norm2_b"]),
            ff1_w=lp["ff1_w"].astype(param_dtype), ff1_b=f32row(lp["ff1_b"]),
            ff2_w=lp["ff2_w"].astype(param_dtype), ff2_b=f32row(lp["ff2_b"]),
        ))
    return dict(
        layers=layers,
        fc1_w=raw["fc1_w"].astype(param_dtype), fc1_b=f32row(raw["fc1_b"]),
        fc2_w=raw["fc2_w"].astype(param_dtype), fc2_b=f32row(raw["fc2_b"]),
    )


def roundtrip_weights(tree, dtype):
    """Round-trip every '*_w' weight matrix through `dtype` (matches kernel weight
    storage) so the f32 reference only differs by matmul precision, not quantization."""
    def walk(obj):
        if isinstance(obj, dict):
            return {k: (walk(v) if isinstance(v, (dict, list))
                        else (v.astype(dtype).astype(jnp.float32)
                              if k.endswith("_w") else v))
                    for k, v in obj.items()}
        if isinstance(obj, list):
            return [walk(v) for v in obj]
        return obj
    return walk(tree)


# ----------------------------- pure-JAX reference -----------------------------

def _ref_linear(x, w, b, relu=False):
    y = x @ w + b
    return jnp.maximum(y, 0.0) if relu else y


def _ref_ln(x, g, b, eps=1e-5):
    m = jnp.mean(x, axis=-1, keepdims=True)
    v = jnp.mean((x - m) ** 2, axis=-1, keepdims=True)
    return (x - m) / jnp.sqrt(v + eps) * g + b


def _ref_mha(p, q, k, v, mask, n_head, model_dim):
    head_dim = model_dim // n_head
    _q = _ref_linear(q, p["wq_w"], p["wq_b"])
    _k = _ref_linear(k, p["wk_w"], p["wk_b"])
    _v = _ref_linear(v, p["wv_w"], p["wv_b"])
    sp = lambda x: x.reshape(x.shape[0], x.shape[1], n_head, head_dim).transpose(0, 2, 1, 3)
    qh, kh, vh = sp(_q), sp(_k), sp(_v)
    score = jnp.einsum("bhqd,bhkd->bhqk", qh, kh)
    if mask is not None:
        score = score + mask * (-1e9)
    attn = jax.nn.softmax(score / math.sqrt(model_dim), axis=-1)
    ctx = jnp.einsum("bhqk,bhkd->bhqd", attn, vh)
    B, H, S, hd = ctx.shape
    ctx = ctx.transpose(0, 2, 1, 3).reshape(B, S, H * hd)
    return _ref_linear(ctx, p["wo_w"], p["wo_b"])


def _ref_decoder(params, x, enc_out, trg_mask, src_mask, n_head, model_dim):
    for p in params["layers"]:
        a = _ref_mha(p["self_attn"], x, x, x, trg_mask, n_head, model_dim)
        q = _ref_ln(a + x, p["norm_g"], p["norm_b"])
        a2 = _ref_mha(p["cross_attn"], q, enc_out, enc_out, src_mask, n_head, model_dim)
        x2 = _ref_ln(a2 + q, p["norm1_g"], p["norm1_b"])
        ff = _ref_linear(_ref_linear(x2, p["ff1_w"], p["ff1_b"], relu=True),
                         p["ff2_w"], p["ff2_b"])
        x = _ref_ln(ff + x2, p["norm2_g"], p["norm2_b"])
    out = _ref_linear(x, params["fc1_w"], params["fc1_b"], relu=True)
    return _ref_linear(out, params["fc2_w"], params["fc2_b"])


# ----------------------------- parameter init -----------------------------

def _init_mha(key, d):
    ks = jax.random.split(key, 8)
    s = 0.05
    r = lambda k, shp: (jax.random.normal(k, shp, jnp.float32) * s)
    return dict(wq_w=r(ks[0], (d, d)), wq_b=r(ks[1], (d,)),
                wk_w=r(ks[2], (d, d)), wk_b=r(ks[3], (d,)),
                wv_w=r(ks[4], (d, d)), wv_b=r(ks[5], (d,)),
                wo_w=r(ks[6], (d, d)), wo_b=r(ks[7], (d,)))


def init_decoder_params(key, vocab, d, n_layers, fe):
    s = 0.05
    params = {"layers": []}
    for _ in range(n_layers):
        key, k1, k2, k3, k4, k5, k6 = jax.random.split(key, 7)
        r = lambda k, shp: (jax.random.normal(k, shp, jnp.float32) * s)
        params["layers"].append(dict(
            self_attn=_init_mha(k1, d),
            cross_attn=_init_mha(k2, d),
            norm_g=jnp.ones((d,), jnp.float32), norm_b=jnp.zeros((d,), jnp.float32),
            norm1_g=jnp.ones((d,), jnp.float32), norm1_b=jnp.zeros((d,), jnp.float32),
            norm2_g=jnp.ones((d,), jnp.float32), norm2_b=jnp.zeros((d,), jnp.float32),
            ff1_w=r(k3, (d, fe * d)), ff1_b=r(k4, (fe * d,)),
            ff2_w=r(k5, (fe * d, d)), ff2_b=r(k6, (d,)),
        ))
    key, k1, k2, k3, k4 = jax.random.split(key, 5)
    r = lambda k, shp: (jax.random.normal(k, shp, jnp.float32) * s)
    params["fc1_w"] = r(k1, (d, d)); params["fc1_b"] = r(k2, (d,))
    params["fc2_w"] = r(k3, (d, vocab)); params["fc2_b"] = r(k4, (vocab,))
    return params


# ----------------------------- main -----------------------------

if __name__ == "__main__":
    B, S_TGT, S_SRC = 2, 8, 16
    EMBED, HEADS, FE, VOCAB, N_LAYERS = 32, 4, 2, 16, 2

    key = jax.random.PRNGKey(0)
    key, kx, ke, kp = jax.random.split(key, 4)
    x = jax.random.normal(kx, (B, S_TGT, EMBED), jnp.float32)
    enc_out = jax.random.normal(ke, (B, S_SRC, EMBED), jnp.float32)

    raw = init_decoder_params(kp, VOCAB, EMBED, N_LAYERS, FE)
    raw = roundtrip_weights(raw, PARAM_DTYPE)   # same bf16 weight storage as the kernels
    params = prepare_decoder_params(raw)        # one-time packing (wkv concat, bf16 cast)

    # causal target mask: 1 above the diagonal = masked (score += mask * -1e9)
    trg_mask = jnp.triu(jnp.ones((S_TGT, S_TGT), jnp.float32), k=1)
    src_mask = None  # Decoder.forward default: no mask materialized for cross-attention

    out = decoder_forward(params, x, enc_out, trg_mask, src_mask, HEADS, EMBED)
    out = jax.block_until_ready(out)

    ref = _ref_decoder(raw, x, enc_out, trg_mask, src_mask, HEADS, EMBED)
    assert out.shape == (B, S_TGT, VOCAB), out.shape
    # bf16 matmuls (f32 accumulation) + approx-reciprocal softmax vs the f32 reference.
    assert jnp.allclose(out, ref, rtol=2e-2, atol=2e-2), "mismatch vs JAX reference"

    print("KERNEL_OK")
</pallas_src>

<mosaic_0001>
module attributes {stable_mosaic.version = 11 : i64} {
  func.func @_probe_copy_kernel(%arg0: i32, %arg1: memref<8x128xf32, #tpu.memory_space<vmem>>, %arg2: memref<8x128xf32, #tpu.memory_space<vmem>>) attributes {dimension_semantics = [#tpu.dimension_semantics<arbitrary>], iteration_bounds = array<i64: 1>, scalar_prefetch = 0 : i64, scratch_operands = 0 : i64, tpu.core_type = #tpu.core_type<tc>, window_params = [{pipeline_mode = #tpu.pipeline_mode<synchronous>, transform_indices = @transform_0, window_bounds = array<i64: 8, 128>}, {pipeline_mode = #tpu.pipeline_mode<synchronous>, transform_indices = @transform_1, window_bounds = array<i64: 8, 128>}]} {
    %c0 = arith.constant 0 : index
    %c0_0 = arith.constant 0 : index
    %0 = vector.load %arg1[%c0, %c0_0] : memref<8x128xf32, #tpu.memory_space<vmem>>, vector<8x128xf32>
    %c0_1 = arith.constant 0 : index
    %c0_2 = arith.constant 0 : index
    %1 = vector.load %arg2[%c0_1, %c0_2] : memref<8x128xf32, #tpu.memory_space<vmem>>, vector<8x128xf32>
    tpu.vector_store %arg2[%c0_1, %c0_2], %0 {strides = array<i32>} : memref<8x128xf32, #tpu.memory_space<vmem>>, vector<8x128xf32>,
    return
  }
  func.func @transform_0(%arg0: i32) -> (i32, i32) {
    %c0_i32 = arith.constant 0 : i32
    %c0_i32_0 = arith.constant 0 : i32
    %c0_i32_1 = arith.constant 0 : i32
    return %c0_i32, %c0_i32_0 : i32, i32
  }
  func.func @transform_1(%arg0: i32) -> (i32, i32) {
    %c0_i32 = arith.constant 0 : i32
    %c0_i32_0 = arith.constant 0 : i32
    %c0_i32_1 = arith.constant 0 : i32
    return %c0_i32, %c0_i32_0 : i32, i32
  }
}

module attributes {stable_mosaic.version = 11 : i64} {
  func.func @_attn_ln_kernel(%arg0: i32, %arg1: i32, %arg2: memref<1x8x32xf32, #tpu.memory_space<vmem>>, %arg3: memref<1x8x32xf32, #tpu.memory_space<vmem>>, %arg4: memref<32x32xbf16, #tpu.memory_space<vmem>>, %arg5: memref<1x32xf32, #tpu.memory_space<vmem>>, %arg6: memref<32x64xbf16, #tpu.memory_space<vmem>>, %arg7: memref<1x64xf32, #tpu.memory_space<vmem>>, %arg8: memref<32x32xbf16, #tpu.memory_space<vmem>>, %arg9: memref<1x32xf32, #tpu.memory_space<vmem>>, %arg10: memref<8x8xf32, #tpu.memory_space<vmem>>, %arg11: memref<1x32xf32, #tpu.memory_space<vmem>>, %arg12: memref<1x32xf32, #tpu.memory_space<vmem>>, %arg13: memref<1x8x32xf32, #tpu.memory_space<vmem>>) attributes {dimension_semantics = [#tpu.dimension_semantics<parallel>, #tpu.dimension_semantics<parallel>], iteration_bounds = array<i64: 2, 1>, scalar_prefetch = 0 : i64, scratch_operands = 0 : i64, tpu.core_type = #tpu.core_type<tc>, window_params = [{transform_indices = @transform_0, window_bounds = array<i64: 1, 8, 32>}, {transform_indices = @transform_1, window_bounds = array<i64: 1, 8, 32>}, {pipeline_mode = #tpu.pipeline_mode<synchronous>, transform_indices = @transform_2, window_bounds = array<i64: 32, 32>}, {pipeline_mode = #tpu.pipeline_mode<synchronous>, transform_indices = @transform_3, window_bounds = array<i64: 1, 32>}, {pipeline_mode = #tpu.pipeline_mode<synchronous>, transform_indices = @transform_4, window_bounds = array<i64: 32, 64>}, {pipeline_mode = #tpu.pipeline_mode<synchronous>, transform_indices = @transform_5, window_bounds = array<i64: 1, 64>}, {pipeline_mode = #tpu.pipeline_mode<synchronous>, transform_indices = @transform_6, window_bounds = array<i64: 32, 32>}, {pipeline_mode = #tpu.pipeline_mode<synchronous>, transform_indices = @transform_7, window_bounds = array<i64: 1, 32>}, {transform_indices = @transform_8, window_bounds = array<i64: 8, 8>}, {pipeline_mode = #tpu.pipeline_mode<synchronous>, transform_indices = @transform_9, window_bounds = array<i64: 1, 32>}, {pipeline_mode = #tpu.pipeline_mode<synchronous>, transform_indices = @transform_10, window_bounds = array<i64: 1, 32>}, {transform_indices = @transform_11, window_bounds = array<i64: 1, 8, 32>}]} {
    %c0 = arith.constant 0 : index
    %c0_0 = arith.constant 0 : index
    %0 = vector.load %arg10[%c0, %c0_0] : memref<8x8xf32, #tpu.memory_space<vmem>>, vector<8x8xf32>
    %cst = arith.constant -1.000000e+09 : f32
    %1 = vector.broadcast %cst : f32 to vector<8x8xf32>
    %2 = arith.mulf %0, %1 : vector<8x8xf32>
    %c0_1 = arith.constant 0 : index
    %c0_2 = arith.constant 0 : index
    %c0_3 = arith.constant 0 : index
    %3 = vector.load %arg2[%c0_1, %c0_2, %c0_3] : memref<1x8x32xf32, #tpu.memory_space<vmem>>, vector<1x8x32xf32>
    %4 = vector.shape_cast %3 : vector<1x8x32xf32> to vector<8x32xf32>
    %c0_4 = arith.constant 0 : index
    %c0_5 = arith.constant 0 : index
    %c0_6 = arith.constant 0 : index
    %5 = vector.load %arg3[%c0_4, %c0_5, %c0_6] : memref<1x8x32xf32, #tpu.memory_space<vmem>>, vector<1x8x32xf32>
    %6 = vector.shape_cast %5 : vector<1x8x32xf32> to vector<8x32xf32>
    %7 = arith.truncf %4 : vector<8x32xf32> to vector<8x32xbf16>
    %c0_7 = arith.constant 0 : index
    %c0_8 = arith.constant 0 : index
    %8 = vector.load %arg4[%c0_7, %c0_8] : memref<32x32xbf16, #tpu.memory_space<vmem>>, vector<32x32xbf16>
    %cst_9 = arith.constant dense<0.000000e+00> : vector<8x32xf32>
    %9 = tpu.matmul %7, %8, %cst_9 {dimension_numbers = #tpu.dot_dimension_numbers<[1], [0], [0], [1], [0, 0, 1, 1], [], []>} : vector<8x32xbf16>, vector<32x32xbf16>, vector<8x32xf32> -> vector<8x32xf32>
    %c0_10 = arith.constant 0 : index
    %c0_11 = arith.constant 0 : index
    %10 = vector.load %arg5[%c0_10, %c0_11] : memref<1x32xf32, #tpu.memory_space<vmem>>, vector<1x32xf32>
    %11 = vector.broadcast %10 : vector<1x32xf32> to vector<8x32xf32>
    %12 = arith.addf %9, %11 : vector<8x32xf32>
    %13 = arith.truncf %6 : vector<8x32xf32> to vector<8x32xbf16>
    %c0_12 = arith.constant 0 : index
    %c0_13 = arith.constant 0 : index
    %14 = vector.load %arg6[%c0_12, %c0_13] : memref<32x64xbf16, #tpu.memory_space<vmem>>, vector<32x64xbf16>
    %cst_14 = arith.constant dense<0.000000e+00> : vector<8x64xf32>
    %15 = tpu.matmul %13, %14, %cst_14 {dimension_numbers = #tpu.dot_dimension_numbers<[1], [0], [0], [1], [0, 0, 1, 1], [], []>} : vector<8x32xbf16>, vector<32x64xbf16>, vector<8x64xf32> -> vector<8x64xf32>
    %c0_15 = arith.constant 0 : index
    %c0_16 = arith.constant 0 : index
    %16 = vector.load %arg7[%c0_15, %c0_16] : memref<1x64xf32, #tpu.memory_space<vmem>>, vector<1x64xf32>
    %17 = vector.broadcast %16 : vector<1x64xf32> to vector<8x64xf32>
    %18 = arith.addf %15, %17 : vector<8x64xf32>
    %19 = vector.extract_strided_slice %18 {offsets = [0, 0], sizes = [8, 32], strides = [1, 1]} : vector<8x64xf32> to vector<8x32xf32>
    %20 = vector.extract_strided_slice %18 {offsets = [0, 32], sizes = [8, 32], strides = [1, 1]} : vector<8x64xf32> to vector<8x32xf32>
    %21 = vector.extract_strided_slice %12 {offsets = [0, 0], sizes = [8, 8], strides = [1, 1]} : vector<8x32xf32> to vector<8x8xf32>
    %22 = arith.truncf %21 : vector<8x8xf32> to vector<8x8xbf16>
    %23 = vector.extract_strided_slice %19 {offsets = [0, 0], sizes = [8, 8], strides = [1, 1]} : vector<8x32xf32> to vector<8x8xf32>
    %24 = arith.truncf %23 : vector<8x8xf32> to vector<8x8xbf16>
    %cst_17 = arith.constant dense<0.000000e+00> : vector<8x8xf32>
    %25 = tpu.matmul %22, %24, %cst_17 {dimension_numbers = #tpu.dot_dimension_numbers<[1], [1], [0], [0], [0, 0, 1, 0], [], []>} : vector<8x8xbf16>, vector<8x8xbf16>, vector<8x8xf32> -> vector<8x8xf32>
    %26 = arith.addf %25, %2 : vector<8x8xf32>
    %cst_18 = arith.constant 0.176776692 : f32
    %27 = vector.broadcast %cst_18 : f32 to vector<8x8xf32>
    %28 = arith.mulf %26, %27 : vector<8x8xf32>
    %cst_19 = arith.constant dense<0xFF800000> : vector<8xf32>
    %29 = vector.multi_reduction <maximumf>, %28, %cst_19 [1] : vector<8x8xf32> to vector<8xf32>
    %30 = vector.shape_cast %29 : vector<8xf32> to vector<8x1xf32>
    %31 = vector.broadcast %30 : vector<8x1xf32> to vector<8x8xf32>
    %32 = arith.subf %28, %31 : vector<8x8xf32>
    %33 = math.exp %32 : vector<8x8xf32>
    %cst_20 = arith.constant dense<0.000000e+00> : vector<8xf32>
    %34 = vector.multi_reduction <add>, %33, %cst_20 [1] : vector<8x8xf32> to vector<8xf32>
    %35 = vector.shape_cast %34 : vector<8xf32> to vector<8x1xf32>
    %36 = tpu.reciprocal %35 {approx = true} : vector<8x1xf32> -> vector<8x1xf32>
    %37 = vector.broadcast %36 : vector<8x1xf32> to vector<8x8xf32>
    %38 = arith.mulf %33, %37 : vector<8x8xf32>
    %39 = arith.truncf %38 : vector<8x8xf32> to vector<8x8xbf16>
    %40 = vector.extract_strided_slice %20 {offsets = [0, 0], sizes = [8, 8], strides = [1, 1]} : vector<8x32xf32> to vector<8x8xf32>
    %41 = arith.truncf %40 : vector<8x8xf32> to vector<8x8xbf16>
    %cst_21 = arith.constant dense<0.000000e+00> : vector<8x8xf32>
    %42 = tpu.matmul %39, %41, %cst_21 {dimension_numbers = #tpu.dot_dimension_numbers<[1], [0], [0], [1], [0, 0, 1, 1], [], []>} : vector<8x8xbf16>, vector<8x8xbf16>, vector<8x8xf32> -> vector<8x8xf32>
    %43 = vector.extract_strided_slice %12 {offsets = [0, 8], sizes = [8, 8], strides = [1, 1]} : vector<8x32xf32> to vector<8x8xf32>
    %44 = arith.truncf %43 : vector<8x8xf32> to vector<8x8xbf16>
    %45 = vector.extract_strided_slice %19 {offsets = [0, 8], sizes = [8, 8], strides = [1, 1]} : vector<8x32xf32> to vector<8x8xf32>
    %46 = arith.truncf %45 : vector<8x8xf32> to vector<8x8xbf16>
    %cst_22 = arith.constant dense<0.000000e+00> : vector<8x8xf32>
    %47 = tpu.matmul %44, %46, %cst_22 {dimension_numbers = #tpu.dot_dimension_numbers<[1], [1], [0], [0], [0, 0, 1, 0], [], []>} : vector<8x8xbf16>, vector<8x8xbf16>, vector<8x8xf32> -> vector<8x8xf32>
    %48 = arith.addf %47, %2 : vector<8x8xf32>
    %cst_23 = arith.constant 0.176776692 : f32
    %49 = vector.broadcast %cst_23 : f32 to vector<8x8xf32>
    %50 = arith.mulf %48, %49 : vector<8x8xf32>
    %cst_24 = arith.constant dense<0xFF800000> : vector<8xf32>
    %51 = vector.multi_reduction <maximumf>, %50, %cst_24 [1] : vector<8x8xf32> to vector<8xf32>
    %52 = vector.shape_cast %51 : vector<8xf32> to vector<8x1xf32>
    %53 = vector.broadcast %52 : vector<8x1xf32> to vector<8x8xf32>
    %54 = arith.subf %50, %53 : vector<8x8xf32>
    %55 = math.exp %54 : vector<8x8xf32>
    %cst_25 = arith.constant dense<0.000000e+00> : vector<8xf32>
    %56 = vector.multi_reduction <add>, %55, %cst_25 [1] : vector<8x8xf32> to vector<8xf32>
    %57 = vector.shape_cast %56 : vector<8xf32> to vector<8x1xf32>
    %58 = tpu.reciprocal %57 {approx = true} : vector<8x1xf32> -> vector<8x1xf32>
    %59 = vector.broadcast %58 : vector<8x1xf32> to vector<8x8xf32>
    %60 = arith.mulf %55, %59 : vector<8x8xf32>
    %61 = arith.truncf %60 : vector<8x8xf32> to vector<8x8xbf16>
    %62 = vector.extract_strided_slice %20 {offsets = [0, 8], sizes = [8, 8], strides = [1, 1]} : vector<8x32xf32> to vector<8x8xf32>
    %63 = arith.truncf %62 : vector<8x8xf32> to vector<8x8xbf16>
    %cst_26 = arith.constant dense<0.000000e+00> : vector<8x8xf32>
    %64 = tpu.matmul %61, %63, %cst_26 {dimension_numbers = #tpu.dot_dimension_numbers<[1], [0], [0], [1], [0, 0, 1, 1], [], []>} : vector<8x8xbf16>, vector<8x8xbf16>, vector<8x8xf32> -> vector<8x8xf32>
    %65 = vector.extract_strided_slice %12 {offsets = [0, 16], sizes = [8, 8], strides = [1, 1]} : vector<8x32xf32> to vector<8x8xf32>
    %66 = arith.truncf %65 : vector<8x8xf32> to vector<8x8xbf16>
    %67 = vector.extract_strided_slice %19 {offsets = [0, 16], sizes = [8, 8], strides = [1, 1]} : vector<8x32xf32> to vector<8x8xf32>
    %68 = arith.truncf %67 : vector<8x8xf32> to vector<8x8xbf16>
    %cst_27 = arith.constant dense<0.000000e+00> : vector<8x8xf32>
    %69 = tpu.matmul %66, %68, %cst_27 {dimension_numbers = #tpu.dot_dimension_numbers<[1], [1], [0], [0], [0, 0, 1, 0], [], []>} : vector<8x8xbf16>, vector<8x8xbf16>, vector<8x8xf32> -> vector<8x8xf32>
    %70 = arith.addf %69, %2 : vector<8x8xf32>
    %cst_28 = arith.constant 0.176776692 : f32
    %71 = vector.broadcast %cst_28 : f32 to vector<8x8xf32>
    %72 = arith.mulf %70, %71 : vector<8x8xf32>
    %cst_29 = arith.constant dense<0xFF800000> : vector<8xf32>
    %73 = vector.multi_reduction <maximumf>, %72, %cst_29 [1] : vector<8x8xf32> to vector<8xf32>
    %74 = vector.shape_cast %73 : vector<8xf32> to vector<8x1xf32>
    %75 = vector.broadcast %74 : vector<8x1xf32> to vector<8x8xf32>
    %76 = arith.subf %72, %75 : vector<8x8xf32>
    %77 = math.exp %76 : vector<8x8xf32>
    %cst_30 = arith.constant dense<0.000000e+00> : vector<8xf32>
    %78 = vector.multi_reduction <add>, %77, %cst_30 [1] : vector<8x8xf32> to vector<8xf32>
    %79 = vector.shape_cast %78 : vector<8xf32> to vector<8x1xf32>
    %80 = tpu.reciprocal %79 {approx = true} : vector<8x1xf32> -> vector<8x1xf32>
    %81 = vector.broadcast %80 : vector<8x1xf32> to vector<8x8xf32>
    %82 = arith.mulf %77, %81 : vector<8x8xf32>
    %83 = arith.truncf %82 : vector<8x8xf32> to vector<8x8xbf16>
    %84 = vector.extract_strided_slice %20 {offsets = [0, 16], sizes = [8, 8], strides = [1, 1]} : vector<8x32xf32> to vector<8x8xf32>
    %85 = arith.truncf %84 : vector<8x8xf32> to vector<8x8xbf16>
    %cst_31 = arith.constant dense<0.000000e+00> : vector<8x8xf32>
    %86 = tpu.matmul %83, %85, %cst_31 {dimension_numbers = #tpu.dot_dimension_numbers<[1], [0], [0], [1], [0, 0, 1, 1], [], []>} : vector<8x8xbf16>, vector<8x8xbf16>, vector<8x8xf32> -> vector<8x8xf32>
    %87 = vector.extract_strided_slice %12 {offsets = [0, 24], sizes = [8, 8], strides = [1, 1]} : vector<8x32xf32> to vector<8x8xf32>
    %88 = arith.truncf %87 : vector<8x8xf32> to vector<8x8xbf16>
    %89 = vector.extract_strided_slice %19 {offsets = [0, 24], sizes = [8, 8], strides = [1, 1]} : vector<8x32xf32> to vector<8x8xf32>
    %90 = arith.truncf %89 : vector<8x8xf32> to vector<8x8xbf16>
    %cst_32 = arith.constant dense<0.000000e+00> : vector<8x8xf32>
    %91 = tpu.matmul %88, %90, %cst_32 {dimension_numbers = #tpu.dot_dimension_numbers<[1], [1], [0], [0], [0, 0, 1, 0], [], []>} : vector<8x8xbf16>, vector<8x8xbf16>, vector<8x8xf32> -> vector<8x8xf32>
    %92 = arith.addf %91, %2 : vector<8x8xf32>
    %cst_33 = arith.constant 0.176776692 : f32
    %93 = vector.broadcast %cst_33 : f32 to vector<8x8xf32>
    %94 = arith.mulf %92, %93 : vector<8x8xf32>
    %cst_34 = arith.constant dense<0xFF800000> : vector<8xf32>
    %95 = vector.multi_reduction <maximumf>, %94, %cst_34 [1] : vector<8x8xf32> to vector<8xf32>
    %96 = vector.shape_cast %95 : vector<8xf32> to vector<8x1xf32>
    %97 = vector.broadcast %96 : vector<8x1xf32> to vector<8x8xf32>
    %98 = arith.subf %94, %97 : vector<8x8xf32>
    %99 = math.exp %98 : vector<8x8xf32>
    %cst_35 = arith.constant dense<0.000000e+00> : vector<8xf32>
    %100 = vector.multi_reduction <add>, %99, %cst_35 [1] : vector<8x8xf32> to vector<8xf32>
    %101 = vector.shape_cast %100 : vector<8xf32> to vector<8x1xf32>
    %102 = tpu.reciprocal %101 {approx = true} : vector<8x1xf32> -> vector<8x1xf32>
    %103 = vector.broadcast %102 : vector<8x1xf32> to vector<8x8xf32>
    %104 = arith.mulf %99, %103 : vector<8x8xf32>
    %105 = arith.truncf %104 : vector<8x8xf32> to vector<8x8xbf16>
    %106 = vector.extract_strided_slice %20 {offsets = [0, 24], sizes = [8, 8], strides = [1, 1]} : vector<8x32xf32> to vector<8x8xf32>
    %107 = arith.truncf %106 : vector<8x8xf32> to vector<8x8xbf16>
    %cst_36 = arith.constant dense<0.000000e+00> : vector<8x8xf32>
    %108 = tpu.matmul %105, %107, %cst_36 {dimension_numbers = #tpu.dot_dimension_numbers<[1], [0], [0], [1], [0, 0, 1, 1], [], []>} : vector<8x8xbf16>, vector<8x8xbf16>, vector<8x8xf32> -> vector<8x8xf32>
    %109 = tpu.concatenate %42, %64, %86, %108 in 1 : vector<8x8xf32>, vector<8x8xf32>, vector<8x8xf32>, vector<8x8xf32> -> vector<8x32xf32>
    %110 = arith.truncf %109 : vector<8x32xf32> to vector<8x32xbf16>
    %c0_37 = arith.constant 0 : index
    %c0_38 = arith.constant 0 : index
    %111 = vector.load %arg8[%c0_37, %c0_38] : memref<32x32xbf16, #tpu.memory_space<vmem>>, vector<32x32xbf16>
    %cst_39 = arith.constant dense<0.000000e+00> : vector<8x32xf32>
    %112 = tpu.matmul %110, %111, %cst_39 {dimension_numbers = #tpu.dot_dimension_numbers<[1], [0], [0], [1], [0, 0, 1, 1], [], []>} : vector<8x32xbf16>, vector<32x32xbf16>, vector<8x32xf32> -> vector<8x32xf32>
    %c0_40 = arith.constant 0 : index
    %c0_41 = arith.constant 0 : index
    %113 = vector.load %arg9[%c0_40, %c0_41] : memref<1x32xf32, #tpu.memory_space<vmem>>, vector<1x32xf32>
    %114 = vector.broadcast %113 : vector<1x32xf32> to vector<8x32xf32>
    %115 = arith.addf %112, %114 : vector<8x32xf32>
    %116 = arith.addf %115, %4 : vector<8x32xf32>
    %cst_42 = arith.constant dense<0.000000e+00> : vector<8xf32>
    %117 = vector.multi_reduction <add>, %116, %cst_42 [1] : vector<8x32xf32> to vector<8xf32>
    %118 = vector.shape_cast %117 : vector<8xf32> to vector<8x1xf32>
    %cst_43 = arith.constant 3.200000e+01 : f32
    %119 = vector.broadcast %cst_43 : f32 to vector<8x1xf32>
    %120 = arith.divf %118, %119 : vector<8x1xf32>
    %121 = vector.broadcast %120 : vector<8x1xf32> to vector<8x32xf32>
    %122 = arith.subf %116, %121 : vector<8x32xf32>
    %123 = arith.mulf %122, %122 : vector<8x32xf32>
    %cst_44 = arith.constant dense<0.000000e+00> : vector<8xf32>
    %124 = vector.multi_reduction <add>, %123, %cst_44 [1] : vector<8x32xf32> to vector<8xf32>
    %125 = vector.shape_cast %124 : vector<8xf32> to vector<8x1xf32>
    %cst_45 = arith.constant 3.200000e+01 : f32
    %126 = vector.broadcast %cst_45 : f32 to vector<8x1xf32>
    %127 = arith.divf %125, %126 : vector<8x1xf32>
    %128 = vector.broadcast %120 : vector<8x1xf32> to vector<8x32xf32>
    %129 = arith.subf %116, %128 : vector<8x32xf32>
    %cst_46 = arith.constant 9.99999974E-6 : f32
    %130 = vector.broadcast %cst_46 : f32 to vector<8x1xf32>
    %131 = arith.addf %127, %130 : vector<8x1xf32>
    %132 = math.rsqrt %131 : vector<8x1xf32>
    %133 = vector.broadcast %132 : vector<8x1xf32> to vector<8x32xf32>
    %134 = arith.mulf %129, %133 : vector<8x32xf32>
    %c0_47 = arith.constant 0 : index
    %c0_48 = arith.constant 0 : index
    %135 = vector.load %arg11[%c0_47, %c0_48] : memref<1x32xf32, #tpu.memory_space<vmem>>, vector<1x32xf32>
    %136 = vector.broadcast %135 : vector<1x32xf32> to vector<8x32xf32>
    %137 = arith.mulf %134, %136 : vector<8x32xf32>
    %c0_49 = arith.constant 0 : index
    %c0_50 = arith.constant 0 : index
    %138 = vector.load %arg12[%c0_49, %c0_50] : memref<1x32xf32, #tpu.memory_space<vmem>>, vector<1x32xf32>
    %139 = vector.broadcast %138 : vector<1x32xf32> to vector<8x32xf32>
    %140 = arith.addf %137, %139 : vector<8x32xf32>
    %c0_51 = arith.constant 0 : index
    %c0_52 = arith.constant 0 : index
    %c0_53 = arith.constant 0 : index
    %141 = vector.load %arg13[%c0_51, %c0_52, %c0_53] : memref<1x8x32xf32, #tpu.memory_space<vmem>>, vector<1x8x32xf32>
    %142 = vector.shape_cast %141 : vector<1x8x32xf32> to vector<8x32xf32>
    %143 = vector.shape_cast %140 : vector<8x32xf32> to vector<1x8x32xf32>
    tpu.vector_store %arg13[%c0_51, %c0_52, %c0_53], %143 {strides = array<i32>} : memref<1x8x32xf32, #tpu.memory_space<vmem>>, vector<1x8x32xf32>,
    return
  }
  func.func @transform_0(%arg0: i32, %arg1: i32) -> (i32, i32, i32) {
    %c0_i32 = arith.constant 0 : i32
    %c0_i32_0 = arith.constant 0 : i32
    return %arg0, %arg1, %c0_i32 : i32, i32, i32
  }
  func.func @transform_1(%arg0: i32, %arg1: i32) -> (i32, i32, i32) {
    %c0_i32 = arith.constant 0 : i32
    %c0_i32_0 = arith.constant 0 : i32
    %c0_i32_1 = arith.constant 0 : i32
    return %arg0, %c0_i32, %c0_i32_0 : i32, i32, i32
  }
  func.func @transform_2(%arg0: i32, %arg1: i32) -> (i32, i32) {
    %c0_i32 = arith.constant 0 : i32
    %c0_i32_0 = arith.constant 0 : i32
    %c0_i32_1 = arith.constant 0 : i32
    return %c0_i32, %c0_i32_0 : i32, i32
  }
  func.func @transform_3(%arg0: i32, %arg1: i32) -> (i32, i32) {
    %c0_i32 = arith.constant 0 : i32
    %c0_i32_0 = arith.constant 0 : i32
    %c0_i32_1 = arith.constant 0 : i32
    return %c0_i32, %c0_i32_0 : i32, i32
  }
  func.func @transform_4(%arg0: i32, %arg1: i32) -> (i32, i32) {
    %c0_i32 = arith.constant 0 : i32
    %c0_i32_0 = arith.constant 0 : i32
    %c0_i32_1 = arith.constant 0 : i32
    return %c0_i32, %c0_i32_0 : i32, i32
  }
  func.func @transform_5(%arg0: i32, %arg1: i32) -> (i32, i32) {
    %c0_i32 = arith.constant 0 : i32
    %c0_i32_0 = arith.constant 0 : i32
    %c0_i32_1 = arith.constant 0 : i32
    return %c0_i32, %c0_i32_0 : i32, i32
  }
  func.func @transform_6(%arg0: i32, %arg1: i32) -> (i32, i32) {
    %c0_i32 = arith.constant 0 : i32
    %c0_i32_0 = arith.constant 0 : i32
    %c0_i32_1 = arith.constant 0 : i32
    return %c0_i32, %c0_i32_0 : i32, i32
  }
  func.func @transform_7(%arg0: i32, %arg1: i32) -> (i32, i32) {
    %c0_i32 = arith.constant 0 : i32
    %c0_i32_0 = arith.constant 0 : i32
    %c0_i32_1 = arith.constant 0 : i32
    return %c0_i32, %c0_i32_0 : i32, i32
  }
  func.func @transform_8(%arg0: i32, %arg1: i32) -> (i32, i32) {
    %c0_i32 = arith.constant 0 : i32
    %c0_i32_0 = arith.constant 0 : i32
    return %arg1, %c0_i32 : i32, i32
  }
  func.func @transform_9(%arg0: i32, %arg1: i32) -> (i32, i32) {
    %c0_i32 = arith.constant 0 : i32
    %c0_i32_0 = arith.constant 0 : i32
    %c0_i32_1 = arith.constant 0 : i32
    return %c0_i32, %c0_i32_0 : i32, i32
  }
  func.func @transform_10(%arg0: i32, %arg1: i32) -> (i32, i32) {
    %c0_i32 = arith.constant 0 : i32
    %c0_i32_0 = arith.constant 0 : i32
    %c0_i32_1 = arith.constant 0 : i32
    return %c0_i32, %c0_i32_0 : i32, i32
  }
  func.func @transform_11(%arg0: i32, %arg1: i32) -> (i32, i32, i32) {
    %c0_i32 = arith.constant 0 : i32
    %c0_i32_0 = arith.constant 0 : i32
    return %arg0, %arg1, %c0_i32 : i32, i32, i32
  }
}

</mosaic_0001>

<bundles_post_ra>
// kernel: tpu_custom_call.1
= control target key start
LH: loop header
LB: loop body
LE: loop exit
PB: predicated region body
PF: predicated region fallthrough
CT: control target
= control target key end

     0   :  { %6 = vsyncpa [#allocation3], 0  ;;  %s124_s0 = inlined_call_operand.hbm [shape: f32[8,128], index: 0, kind: input, shape index: {}]   ;;  %s125_s1 = inlined_call_operand.hbm [shape: f32[8,128], index: 1, kind: output, shape index: {}]  }
   0x1   :  { %7 = vsyncpa [#allocation4], 0  ;;  %s88_s6 = smov [#allocation2]   ;;  %s40_s10 = scalar_lea.hbm %s124_s0, 128 }
   0x2   :  { %s14_s7 = sshll.u32 %s88_s6, 4  ;;  %p41_p0 = scmp.ne.s32.totalorder %s124_s0, %s40_s10  ;;  %s15_s7 = int_to_ptr.vmem [resolvable:$true] %s14_s7 }
   0x3   :  { %p44_p1 = scmp.lt.u32.totalorder %s40_s10, %s124_s0 }
   0x5   :  { %p46_p2 = pnand %p44_p1, %p41_p0 }
   0x7   :  { %49 = shalt.err (!%p46_p2)
}
   0x8   :  { %s50_s15 = scalar_lea.vmem %s15_s7, 128  ;;  %p55_p4 = scmp.lt.s32.totalorder %s15_s7, %s15_s7 }
   0x9   :  { %p51_p3 = scmp.ne.s32.totalorder %s15_s7, %s50_s15  ;;  %p56_p5 = scmp.lt.s32.totalorder %s50_s15, %s50_s15 }
   0xb   :  { %p57_p6 = por %p56_p5, %p55_p4 }
   0xd   :  { %p58_p7 = pnand %p57_p6, %p51_p3 }
   0xf   :  { %61 = shalt.err (!%p58_p7)
}
  0x10   :  { %17 = dma.hbm_to_vmem [thread:$0]  %s124_s0, 128, %s15_s7, [#allocation3]  }
  0x11   :  { %84 = dma.done.wait [#allocation3], 128  }
  0x12   :  { %85 = vsyncadd [#allocation3], 4294967168  ;;  %s89_s18 = smov [#allocation5]   ;;  %v21_v0 = vld [vmem:[#allocation2] sm:$0xff] }
  0x13   :  { %s29_s19 = sshll.u32 %s89_s18, 4  ;;  %22 = vst [vmem:[#allocation5] sm:$0xff] %v21_v0  ;;  %s30_s19 = int_to_ptr.vmem [resolvable:$true] %s29_s19 }
  0x14   :  { %s62_s20 = scalar_lea.vmem %s30_s19, 128  ;;  %p67_p9 = scmp.lt.s32.totalorder %s30_s19, %s30_s19 }
  0x15   :  { %p63_p8 = scmp.ne.s32.totalorder %s30_s19, %s62_s20  ;;  %p68_p10 = scmp.lt.s32.totalorder %s62_s20, %s62_s20 }
  0x17   :  { %p69_p11 = por %p68_p10, %p67_p9 }
  0x19   :  { %p70_p12 = pnand %p69_p11, %p63_p8 }
  0x1b   :  { %73 = shalt.err (!%p70_p12)
}
  0x1c   :  { %s74_s23 = scalar_lea.hbm %s125_s1, 128 }
  0x1d   :  { %p75_p13 = scmp.ne.s32.totalorder %s125_s1, %s74_s23  ;;  %p78_p0 = scmp.lt.u32.totalorder %s74_s23, %s125_s1 }
  0x1f   :  { %p80_p1 = pnand %p78_p0, %p75_p13 }
  0x21   :  { %83 = shalt.err (!%p80_p1)
}
  0x22   :  { %32 = dma.vmem_to_hbm [thread:$0]  %s30_s19, 128, %s125_s1, [#allocation4]  }
  0x23   :  { %86 = dma.done.wait [#allocation4], 128  }
  0x24   :  { %87 = vsyncadd [#allocation4], 4294967168 }
  0x25   :  { %36 = vsyncpa [#allocation3], 1 }
  0x26   :  { %37 = vsyncpa [#allocation4], 1 }

// kernel: tpu_custom_call.1
= control target key start
LH: loop header
LB: loop body
LE: loop exit
PB: predicated region body
PF: predicated region fallthrough
CT: control target
= control target key end

     0   :  { %s2390_s0 = inlined_call_operand.hbm [shape: f32[2,8,32], index: 0, kind: input, shape index: {}]   ;;  %s2391_s1 = inlined_call_operand.hbm [shape: f32[2,8,32], index: 1, kind: input, shape index: {}]   ;;  %s2392_s2 = inlined_call_operand.hbm [shape: bf16[32,32], index: 2, kind: input, shape index: {}]   ;;  %s2393_s3 = inlined_call_operand.vmem [shape: f32[1,32], index: 3, kind: input, shape index: {}]   ;;  %s2394_s4 = inlined_call_operand.hbm [shape: bf16[32,64], index: 4, kind: input, shape index: {}]   ;;  %s2395_s5 = inlined_call_operand.vmem [shape: f32[1,64], index: 5, kind: input, shape index: {}]   ;;  %s2396_s6 = inlined_call_operand.vmem [shape: bf16[32,32], index: 6, kind: input, shape index: {}]   ;;  %s2397_s7 = inlined_call_operand.hbm [shape: f32[1,32], index: 7, kind: input, shape index: {}]   ;;  %s2398_s8 = inlined_call_operand.vmem [shape: f32[8,8], index: 8, kind: input, shape index: {}]   ;;  %s2399_s9 = inlined_call_operand.vmem [shape: f32[1,32], index: 9, kind: input, shape index: {}]   ;;  %s2400_s10 = inlined_call_operand.vmem [shape: f32[1,32], index: 10, kind: input, shape index: {}]   ;;  %s2401_s11 = inlined_call_operand.hbm [shape: f32[2,8,32], index: 11, kind: output, shape index: {}]  }
   0x1   :  { %2410 = sst [smem:[#allocation20_spill]] %s2392_s2 }
   0x2   :  { %2411 = sst [smem:[#allocation21_spill]] %s2394_s4 }
   0x3   :  { %2412 = sst [smem:[#allocation22_spill]] %s2396_s6 }
   0x4   :  { %2413 = sst [smem:[#allocation23_spill]] %s2397_s7 }
   0x5   :  { %2414 = sst [smem:[#allocation24_spill]] %s2399_s9 }
   0x6   :  { %2415 = sst [smem:[#allocation25_spill]] %s2400_s10 }
   0x7   :  { %2416 = sst [smem:[#allocation26_spill]] %s2401_s11 }
   0x8   :  { %16 = vsyncpa [#allocation3], 0 }
   0x9   :  { %18 = vsyncpa [#allocation3 + $0x1], 0 }
   0xa   :  { %19 = vsyncpa [#allocation6], 0 }
   0xb   :  { %21 = vsyncpa [#allocation6 + $0x1], 0 }
   0xc   :  { %22 = vsyncpa [#allocation9], 0 }
   0xd   :  { %23 = vsyncpa [#allocation4], 0 }
   0xe   :  { %25 = vsyncpa [#allocation4 + $0x1], 0  ;;  %s1975_s17 = smov 0   ;;  %s1977_s18 = smov 0  }
   0xf   :  { %s1979_s19 = smov 0   ;;  %s1981_s20 = smov 0  }
  0x10   :  { %s1983_s21 = smov 0   ;;  %s1985_s22 = smov 0  }
  0x11 LB: > { %2417 = sst [smem:[#allocation17_spill]] %s1873_s17  ;;  %s2006_s23 = sadd.s32 4294967295, %s1893_s22   ;;  %s1893_s22 = sphi %s1985_s22, %s31_s22   ;;  %s1889_s21 = sphi %s1983_s21, %s2451_s21   ;;  %s1885_s20 = sphi %s1981_s20, %s2450_s20   ;;  %s1881_s19 = sphi %s1979_s19, %s2449_s19   ;;  %s1877_s18 = sphi %s1977_s18, %s2448_s18   ;;  %s1873_s17 = sphi %s1975_s17, %s2447_s17  }
  0x12   : > { %2418 = sst [smem:[#allocation18_spill]] %s1885_s20  ;;  %s1378_s24 = sadd.s32 4294967294, %s1893_s22  }
  0x13   : > { %p65_p0 = scmp.ne.s32.totalorder %s1877_s18, %s1873_s17  ;;  %p2405_p1 = scmp.eq.s32.totalorder %s2006_s23, 0 }
  0x14   : > { %p317_p3 = scmp.eq.s32.totalorder %s1378_s24, 1  ;;  %p1379_p5 = scmp.ge.s32.totalorder %s1893_s22, 1 }
  0x15   : > { %p2015_p4 = por %p2405_p1, %p65_p0  ;;  %p324_p7 = scmp.lt.s32.totalorder %s1893_s22, 3 }
  0x16   : > { %p2020_p6 = por %p317_p3, %p65_p0  ;;  %s1895_s28 = smov [#allocation7]  }
  0x17   : > { %s2419_s25 = scalar_select %p2015_p4, 1, 0 }
  0x18   : > { %s2420_s26 = scalar_select %p2020_p6, 1, 0 }
  0x19   : > { %p2025_p8 = pnand %p1379_p5, %p324_p7  ;;  %s336_s29 = sshll.u32 %s1895_s28, 4  ;;  %s2029_s29 = int_to_ptr.vmem [resolvable:$true] %s336_s29 }
  0x1a   : > { %2421 = sst [smem:[#allocation19_spill]] %s2420_s26  ;;  %s1896_s12 = smov [#allocation8]  }
  0x1b   : > { %s2422_s27 = scalar_select %p2025_p8, 1, 0 }
  0x1c   : > { %p1537_p9 = pneg %p2025_p8  ;;  %s352_s13 = sshll.u32 %s1896_s12, 4  ;;  %s2040_s13 = int_to_ptr.vmem [resolvable:$true] %s352_s13 }
  0x1d   : > { %s1897_s14 = smov [#allocation10]   ;;  %s2424_s2 = sld [smem:[#allocation20_spill]] }
  0x1e   : > { %p2036_p11 = pnand %p1537_p9, %p2405_p1  ;;  %s2042_s15 = sshll.u32 %s1897_s14, 4  ;;  %s373_s15 = int_to_ptr.vmem [resolvable:$true] %s2042_s15 }
  0x20   : > { %p2052_p13 = pneg %p2036_p11 }
  0x23   : > { %s1655_s28 = scalar_lea.hbm %s2424_s2, 256 }
  0x24   : > { %p1656_p12 = scmp.ne.s32.totalorder %s2424_s2, %s1655_s28  ;;  %p1662_p5 = scmp.lt.u32.totalorder %s1655_s28, %s2424_s2 }
  0x26   : > { %p1658_p0 = pnand %p2052_p13, %p1656_p12 }
  0x28   : > { %p1659_p3 = pneg %p1658_p0 }
  0x2a   : > { %p1664_p7 = pnand %p1662_p5, %p1659_p3 }
  0x2c   : > { %1667 = shalt.err (!%p1664_p7)
}
  0x2d   : > { %s1668_s17 = scalar_lea.vmem %s2029_s29, 256  ;;  %p1676_p2 = scmp.lt.s32.totalorder %s2029_s29, %s2029_s29 }
  0x2e   : > { %p1669_p9 = scmp.ne.s32.totalorder %s2029_s29, %s1668_s17  ;;  %p1677_p6 = scmp.lt.s32.totalorder %s1668_s17, %s1668_s17 }
  0x30   : > { %p1671_p10 = pnand %p1669_p9, %p2052_p13  ;;  %p1678_p12 = por %p1677_p6, %p1676_p2 }
  0x32   : > { %p1672_p1 = pneg %p1671_p10 }
  0x34   : > { %p1679_p0 = pnand %p1678_p12, %p1672_p1 }
  0x36   : > { %1682 = shalt.err (!%p1679_p0)
}
  0x37   : > { %s1898_s26 = smov 64   ;;  %s1899_s16 = smov 4  }
  0x38   : > { %1540 = dma.hbm_to_vmem [thread:$0]  (!%p2036_p11), %s2424_s2, 256, %s2029_s29, [#allocation6], %s1898_s26, %s1898_s26, %s1899_s16  }
  0x39   : > { %s2426_s4 = sld [smem:[#allocation21_spill]] }
  0x3f   : > { %s1683_s10 = scalar_lea.hbm %s2426_s4, 256 }
  0x40   : > { %p1684_p2 = scmp.ne.s32.totalorder %s2426_s4, %s1683_s10  ;;  %p1690_p10 = scmp.lt.u32.totalorder %s1683_s10, %s2426_s4 }
  0x42   : > { %p1686_p1 = pnand %p1684_p2, %p2052_p13 }
  0x44   : > { %p1687_p6 = pneg %p1686_p1 }
  0x46   : > { %p1692_p3 = pnand %p1690_p10, %p1687_p6 }
  0x48   : > { %1695 = shalt.err (!%p1692_p3)
}
  0x49   : > { %s1696_s29 = scalar_lea.vmem %s2040_s13, 256  ;;  %p1704_p12 = scmp.lt.s32.totalorder %s2040_s13, %s2040_s13 }
  0x4a   : > { %p1697_p5 = scmp.ne.s32.totalorder %s2040_s13, %s1696_s29  ;;  %p1705_p0 = scmp.lt.s32.totalorder %s1696_s29, %s1696_s29 }
  0x4c   : > { %p1699_p7 = pnand %p1697_p5, %p2052_p13  ;;  %p1706_p2 = por %p1705_p0, %p1704_p12 }
  0x4e   : > { %p1700_p9 = pneg %p1699_p7 }
  0x50   : > { %p1707_p1 = pnand %p1706_p2, %p1700_p9 }
  0x52   : > { %1710 = shalt.err (!%p1707_p1)
}
  0x53   : > { %1543 = dma.hbm_to_vmem [thread:$0]  (!%p2036_p11), %s2426_s4, 256, %s2040_s13, [#allocation9], %s1898_s26, %s1898_s26, %s1899_s16  }
  0x54   : > { %s2427_s7 = sld [smem:[#allocation23_spill]] }
  0x5a   : > { %s1711_s24 = scalar_lea.hbm %s2427_s7, 16 }
  0x5b   : > { %p1712_p6 = scmp.ne.s32.totalorder %s2427_s7, %s1711_s24  ;;  %p1718_p5 = scmp.lt.u32.totalorder %s1711_s24, %s2427_s7 }
  0x5d   : > { %p1714_p10 = pnand %p1712_p6, %p2052_p13 }
  0x5f   : > { %p1715_p3 = pneg %p1714_p10 }
  0x61   : > { %p1720_p7 = pnand %p1718_p5, %p1715_p3 }
  0x63   : > { %1723 = shalt.err (!%p1720_p7)
}
  0x64   : > { %s1724_s29 = scalar_lea.vmem %s373_s15, 16  ;;  %s1731_s13 = scalar_lea.vmem %s373_s15, 32 }
  0x65   : > { %p1725_p9 = scmp.ne.s32.totalorder %s373_s15, %s1724_s29  ;;  %p1732_p2 = scmp.lt.s32.totalorder %s373_s15, %s373_s15 }
  0x66   : > { %p1733_p1 = scmp.lt.s32.totalorder %s1731_s13, %s1724_s29 }
  0x67   : > { %p1727_p12 = pnand %p1725_p9, %p2052_p13 }
  0x68   : > { %p1734_p4 = por %p1733_p1, %p1732_p2 }
  0x69   : > { %p1728_p0 = pneg %p1727_p12 }
  0x6b   : > { %p1735_p8 = pnand %p1734_p4, %p1728_p0 }
  0x6d   : > { %1738 = shalt.err (!%p1735_p8)
}
  0x6e   : > { %1546 = dma.hbm_to_vmem [thread:$0]  (!%p2036_p11), %s2427_s7, 16, %s373_s15, [#allocation9]  }
  0x6f   : > { %s52_s11 = sadd.s32 1, %s1881_s19  ;;  %s43_s6 = sadd.s32 1, %s1889_s21 }
  0x70   : > { %p59_p4 = scmp.ne.s32.totalorder %s1881_s19, %s1877_s18  ;;  %p45_p8 = scmp.ge.s32.totalorder %s43_s6, 2 }
  0x71   : > { %p60_p13 = scmp.eq.s32.totalorder %s1893_s22, 0  ;;  %p2428_p6 = scmp.eq.s32.totalorder %s2006_s23, 1 }
  0x72   : > { %p1561_p3 = scmp.lt.s32.totalorder %s1893_s22, 2  ;;  %s2453_s6 = smov (%p45_p8, %s43_s6), 0 }
  0x73   : > { %p2122_p10 = por %p2428_p6, %p59_p4  ;;  %p61_p5 = por %p60_p13, %p59_p4 }
  0x74   : > { %s396_s9 = sand.u32 1, %s1881_s19   ;;  %s47_s10 = ssub.s32 %s1889_s21, %s2453_s6 }
  0x75   : > { %s2429_s30 = scalar_select %p2122_p10, 1, 0 }
  0x76   : > { %p50_p11 = scmp.eq.s32.totalorder %s47_s10, 0  ;;  %s2132_s15 = sshll.u32 %s396_s9, 3 }
  0x77   : > { %s1386_s20 = sshll.u32 %s1889_s21, 7  ;;  %s400_s17 = scalar_lea.vmem [#allocation2], %s2132_s15 }
  0x78   : > { %s2136_s24 = scalar_select %p50_p11, %s1881_s19, %s52_s11  }
  0x79   : > { %s2141_s14 = scalar_lea.hbm %s2390_s0, %s1386_s20  ;;  %s408_s29 = sshll.u32 %s400_s17, 4  ;;  %s2144_s29 = int_to_ptr.vmem [resolvable:$true] %s408_s29 }
  0x7a   : > { %p2148_p7 = pnand %p1561_p3, %p61_p5  ;;  %s2155_s11 = scalar_lea.hbm %s2391_s1, %s1386_s20 }
  0x7b   : > { %s415_s10 = sand.u32 1, %s1893_s22   ;;  %s397_s28 = scalar_lea.sflag [#allocation3], %s396_s9 }
  0x7c   : > { %s1739_s12 = scalar_lea.hbm %s2141_s14, 128  ;;  %p1741_p12 = pneg %p2148_p7 }
  0x7d   : > { %p1740_p9 = scmp.ne.s32.totalorder %s2141_s14, %s1739_s12  ;;  %s1744_s4 = scalar_lea.hbm %s2390_s0, 256 }
  0x7e   : > { %p1745_p1 = scmp.lt.u32.totalorder %s2141_s14, %s2390_s0  ;;  %p1746_p4 = scmp.lt.u32.totalorder %s1744_s4, %s1739_s12 }
  0x7f   : > { %p1742_p0 = pnand %p1741_p12, %p1740_p9  ;;  %p1748_p13 = scmp.lt.u32.totalorder %s1739_s12, %s2141_s14 }
  0x80   : > { %p1747_p8 = por %p1746_p4, %p1745_p1 }
  0x81   : > { %p1743_p2 = pneg %p1742_p0 }
  0x82   : > { %p1749_p6 = por %p1748_p13, %p1747_p8 }
  0x84   : > { %p1750_p3 = pnand %p1749_p6, %p1743_p2 }
  0x86   : > { %1753 = shalt.err (!%p1750_p3)
}
  0x87   : > { %s1754_s9 = scalar_lea.vmem %s2144_s29, 128  ;;  %s1900_s2 = smov [#allocation2]  }
  0x88   : > { %p1755_p5 = scmp.ne.s32.totalorder %s2144_s29, %s1754_s9  ;;  %s1759_s20 = sshll.u32 %s1900_s2, 4  ;;  %s1760_s20 = int_to_ptr.vmem [resolvable:$false] %s1759_s20 }
  0x89   : > { %s1761_s7 = scalar_lea.vmem %s1760_s20, 256  ;;  %p1762_p0 = scmp.lt.s32.totalorder %s2144_s29, %s1760_s20 }
  0x8a   : > { %p1757_p11 = pnand %p1755_p5, %p1741_p12  ;;  %p1763_p1 = scmp.lt.s32.totalorder %s1761_s7, %s1754_s9 }
  0x8c   : > { %p1758_p9 = pneg %p1757_p11  ;;  %p1764_p4 = por %p1763_p1, %p1762_p0 }
  0x8e   : > { %p1765_p8 = pnand %p1764_p4, %p1758_p9 }
  0x90   : > { %1768 = shalt.err (!%p1765_p8)
}
  0x91   : > { %1550 = dma.hbm_to_vmem [thread:$0]  (!%p2148_p7), %s2141_s14, 128, %s2144_s29, %s397_s28  }
  0x92   : > { %s419_s4 = scalar_lea.vmem [#allocation5], %s2132_s15  ;;  %s416_s12 = scalar_lea.sflag [#allocation6], %s415_s10 }
  0x93   : > { %s426_s16 = sshll.u32 %s419_s4, 4  ;;  %s1769_s17 = scalar_lea.hbm %s2155_s11, 128  ;;  %s427_s16 = int_to_ptr.vmem [resolvable:$true] %s426_s16 }
  0x94   : > { %p1770_p2 = scmp.ne.s32.totalorder %s2155_s11, %s1769_s17  ;;  %s1774_s2 = scalar_lea.hbm %s2391_s1, 256 }
  0x95   : > { %p1775_p3 = scmp.lt.u32.totalorder %s2155_s11, %s2391_s1  ;;  %p1776_p5 = scmp.lt.u32.totalorder %s1774_s2, %s1769_s17 }
  0x96   : > { %p1772_p13 = pnand %p1770_p2, %p1741_p12  ;;  %p1778_p9 = scmp.lt.u32.totalorder %s1769_s17, %s2155_s11 }
  0x97   : > { %p1777_p11 = por %p1776_p5, %p1775_p3 }
  0x98   : > { %p1773_p6 = pneg %p1772_p13 }
  0x99   : > { %p1779_p0 = por %p1778_p9, %p1777_p11 }
  0x9b   : > { %p1780_p1 = pnand %p1779_p0, %p1773_p6 }
  0x9d   : > { %1783 = shalt.err (!%p1780_p1)
}
  0x9e   : > { %s1784_s15 = scalar_lea.vmem %s427_s16, 128  ;;  %s1901_s14 = smov [#allocation5]  }
  0x9f   : > { %p1785_p4 = scmp.ne.s32.totalorder %s427_s16, %s1784_s15  ;;  %s1789_s29 = sshll.u32 %s1901_s14, 4  ;;  %s1790_s29 = int_to_ptr.vmem [resolvable:$false] %s1789_s29 }
  0xa0   : > { %s1791_s10 = scalar_lea.vmem %s1790_s29, 256  ;;  %p1792_p13 = scmp.lt.s32.totalorder %s427_s16, %s1790_s29 }
  0xa1   : > { %p1787_p8 = pnand %p1785_p4, %p1741_p12  ;;  %p1793_p10 = scmp.lt.s32.totalorder %s1791_s10, %s1784_s15 }
  0xa3   : > { %p1788_p2 = pneg %p1787_p8  ;;  %p1794_p3 = por %p1793_p10, %p1792_p13 }
  0xa5   : > { %p1795_p5 = pnand %p1794_p3, %p1788_p2 }
  0xa7   : > { %1798 = shalt.err (!%p1795_p5)
}
  0xa8   : > { %1553 = dma.hbm_to_vmem [thread:$0]  (!%p2148_p7), %s2155_s11, 128, %s427_s16, %s416_s12  }
  0xa9   : > { %p2431_p6 = scmp.ne.s32.totalorder %s2422_s27, 0 }
  0xaa   : > { %s2208_s28 = sand.u32 (!%p2431_p6), 1, %s1877_s18   ;;  %p2432_p10 = scmp.ne.s32.totalorder (!%p2431_p6), %s2419_s25, 0 }
  0xab   : > { %435 = sbr.rel (%p2431_p6) target bundleno = 1967 (0x7af), region = 64  ;;  %s2211_s4 = sshll.u32 (!%p2431_p6), %s2208_s28, 3 }
  0xac   : > { %s438_s17 = scalar_lea.sflag (!%p2431_p6), [#allocation3], %s2208_s28  ;;  %s441_s26 = scalar_lea.vmem (!%p2431_p6), [#allocation2], %s2211_s4 }
  0xb2   : > { %1852 = dma.done.wait (%p2432_p10), %s438_s17, 128  }
  0xb3   : > { %1854 = vsyncadd (%p2432_p10), %s438_s17, 4294967168  ;;  %s446_s27 = sand.u32 1, %s2006_s23   ;;  %s450_s11 = scalar_lea.vmem [#allocation5], %s2211_s4 }
  0xb4   : > { %s447_s13 = scalar_lea.sflag [#allocation6], %s446_s27 }
  0xb5   : > { %1856 = dma.done.wait (%p2432_p10), %s447_s13, 128  }
  0xb6   : > { %1858 = vsyncadd (%p2432_p10), %s447_s13, 4294967168  ;;  %p2433_p7 = scmp.eq.s32.totalorder %s2006_s23, 0 }
  0xb8   : > { %1860 = dma.done.wait (%p2433_p7), [#allocation6], 256   ;;  %p2434_p12 = pmov %p2433_p7 }
  0xb9   : > { %p2435_p11 = pmov %p2433_p7 }
  0xba   : > { %1862 = vsyncadd (%p2434_p12), [#allocation6], 4294967040 }
  0xbb   : > { %1864 = dma.done.wait (%p2435_p11), [#allocation9], 272   ;;  %p2436_p9 = pmov %p2433_p7 }
  0xbc   : > { %v1902_v0 = vmov 0.0   ;;  %vm1903_vm0 = vmmov 0   ;;  %v1631_v1 = vld [vmem:[#allocation8] sm:$0xff]   ;;  %v1632_v2 = vld [vmem:[#allocation7] sm:$0xff]   ;;  %v1633_v3 = vld [vmem:[#allocation8 + $0x8] sm:$0xff]   ;;  %vm543_vm1 = vcmask 261120  }
  0xbd   : > { %1866 = vsyncadd (%p2436_p9), [#allocation9], 4294967024  ;;  %1455 = vmatprep.subr.bf16.mxu1 %v1902_v0  ;;  %1447 = vmatprep.subr.bf16.mxu0 %v1902_v0  ;;  %v518_v4 = vld [vmem:[%s450_s11] sm:$0xff]  ;;  %v1634_v5 = vld [vmem:[#allocation7 + $0x8] sm:$0xff]   ;;  %vm656_vm2 = vcmask 64512   ;;  %s1904_s9 = smov 112  }
  0xbe   : > { %1459 = vmatprep.mubr.msk.bf16.mxu1 %vm1903_vm0, %v1902_v0  ;;  %1451 = vmatprep.mubr.msk.bf16.mxu0 %vm1903_vm0, %v1902_v0  ;;  %v2241_v6 = vld [vmem:[%s441_s26] sm:$0xff]  ;;  %v587_v7 = vpack.c.bf16 %v518_v4, %v518_v4  ;;  %s1905_s2 = smov 120   ;;  %s1906_s20 = smov 104   ;;  %vm722_vm3 = vcmask 1043456   ;;  %vm1113_vm4 = vcmask 130048   ;;  %vm1115_vm5 = vcmask 195584  }
  0xbf   : > { %1456 = vmatpush3.bf16.msra.mxu1 %v1631_v1  ;;  %1448 = vmatpush3.bf16.msra.mxu0 %v1632_v2  ;;  %v519_v8 = vpack.c.bf16 %v2241_v6, %v2241_v6  ;;  %v1400_v9 = vld [vmem:[%s2395_s5] ss:$0 sm:$0xff]  ;;  %s1907_s14 = smov 96   ;;  %s1908_s29 = smov 80  }
  0xc0   : > { %1457 = vmatprep.subr.bf16.mxu1 %v1902_v0  ;;  %1449 = vmatprep.subr.bf16.mxu0 %v1902_v0  ;;  %v1396_v10 = vld [vmem:[%s2393_s3] ss:$0 sm:$0xff]  ;;  %s1909_s10 = smov 72   ;;  %s1910_s17 = smov 88  }
  0xc1   : > { %v515_v33 = vld [vmem:[%s2398_s8] sm:$0xff]  ;;  %s2437_s13 = sld [smem:[#allocation22_spill]]  ;;  %s1911_s11 = smov 8  }
  0xc2   : > { %v516_v34 = vmul.f32 -1e+09, %v515_v33  ;;  %s1912_s16 = smov 16   ;;  %s1913_s12 = smov 24  }
  0xc3   : > { %1458 = vmatpush3.bf16.msra.mxu1 %v1633_v3  ;;  %1450 = vmatpush3.bf16.msra.mxu0 %v1634_v5  ;;  %s2439_s7 = sld [smem:[#allocation24_spill]]  ;;  %s2441_s23 = sld [smem:[#allocation26_spill]] }
  0xc4   : > { %1469 = vmatprep.subr.bf16.mxu1 %v1902_v0  ;;  %1463 = vmatprep.subr.bf16.mxu0 %v1902_v0  ;;  %p2442_p1 = scmp.ne.s32.totalorder %s2429_s30, 0 }
  0xc6   : > { %1460 = vmatmul.mubr.msk.bf16.vlgmr.msra.gmra.mrb[0].mxu1 %vm543_vm1, %v587_v7  ;;  %1452 = vmatmul.mubr.msk.bf16.vlgmr.msra.gmra.mrb[0].mxu0 %vm543_vm1, %v519_v8 }
  0xc7   : > { %1471 = vmatprep.mubr.msk.bf16.mxu1 %vm1903_vm0, %v1902_v0  ;;  %1465 = vmatprep.mubr.msk.bf16.mxu0 %vm1903_vm0, %v1902_v0 }
 0x199   : > { %v648_v11 = vpop.f32.mrb[0].mxu1  ;;  %v581_v14 = vpop.f32.mrb[0].mxu0 }
 0x19a   : > { %v649_v12 = vadd.f32 %v1400_v9, %v648_v11  ;;  %v1461_v13 = vpop.f32.mrb[1].mxu1  ;;  %v582_v16 = vadd.f32 %v1396_v10, %v581_v14  ;;  %v1453_v17 = vpop.f32.mrb[1].mxu0 }
 0x19b   : > { %v651_v15 = vpop.f32.mrb[2].mxu1  ;;  %v584_v20 = vpop.f32.mrb[2].mxu0 }
 0x19c   : > { %v2259_v18 = vpack.c.bf16 %v649_v12, %v649_v12  ;;  %v1462_v19 = vpop.f32.mrb[3].mxu1  ;;  %v1454_v21 = vpop.f32.mrb[3].mxu0  ;;  %v654_v22 = vpack.c.bf16 %v582_v16, %v582_v16 }
 0x19e   : > { %880 = vrot.lane.b32.xlu1 %v2259_v18, %s1904_s9  ;;  %769 = vrot.lane.b32.xlu0 %v2259_v18, %s1905_s2  ;;  %v661_v23 = vsel %vm656_vm2, %v2259_v18, 0 }
 0x19f   : > { %1464 = vmatpush3.bf16.xpose.msra.mxu0 %v661_v23 }
 0x1a0   : > { %1475 = vmatprep.subr.bf16.mxu0 %v1902_v0 }
 0x1a2   : > { %878 = vrot.lane.b32.xlu1 %v654_v22, %s1904_s9  ;;  %767 = vrot.lane.b32.xlu0 %v654_v22, %s1905_s2  ;;  %s2438_s9 = sld [smem:[#allocation18_spill]] }
 0x1a6   : > { %989 = vrot.lane.b32.xlu1 %v654_v22, %s1906_s20  ;;  %991 = vrot.lane.b32.xlu0 %v2259_v18, %s1906_s20 }
 0x1a7   : > { %1466 = vmatmul.mubr.msk.bf16.vlgmr.msra.gmra.mrb[4].mxu0 %vm656_vm2, %v654_v22 }
 0x1a8   : > { %1477 = vmatprep.mubr.msk.bf16.mxu0 %vm1903_vm0, %v1902_v0 }
 0x210   : > { %v770_v24 = vpop.permute.xlu0 %769  ;;  %v881_v26 = vpop.permute.xlu1 %880 }
 0x211   : > { %v775_v25 = vsel %vm656_vm2, %v770_v24, 0  ;;  %v886_v28 = vsel %vm656_vm2, %v881_v26, 0 }
 0x212   : > { %1476 = vmatpush3.bf16.xpose.msra.mxu0 %v775_v25 }
 0x213   : > { %1487 = vmatprep.subr.bf16.mxu0 %v1902_v0 }
 0x214   : > { %v768_v27 = vpop.permute.xlu0 %767  ;;  %v879_v30 = vpop.permute.xlu1 %878 }
 0x218   : > { %v992_v29 = vpop.permute.xlu0 %991  ;;  %v990_v32 = vpop.permute.xlu1 %989 }
 0x219   : > { %1478 = vmatmul.mubr.msk.bf16.vlgmr.msra.gmra.mrb[8].mxu0 %vm656_vm2, %v768_v27  ;;  %v997_v31 = vsel %vm656_vm2, %v992_v29, 0 }
 0x21a   : > { %1488 = vmatpush3.bf16.xpose.msra.mxu0 %v886_v28  ;;  %1489 = vmatprep.mubr.msk.bf16.mxu0 %vm1903_vm0, %v1902_v0 }
 0x21b   : > { %1499 = vmatprep.subr.bf16.mxu0 %v1902_v0 }
 0x221   : > { %1490 = vmatmul.mubr.msk.bf16.vlgmr.msra.gmra.mrb[12].mxu0 %vm656_vm2, %v879_v30 }
 0x222   : > { %1500 = vmatpush3.bf16.xpose.msra.mxu0 %v997_v31  ;;  %1501 = vmatprep.mubr.msk.bf16.mxu0 %vm1903_vm0, %v1902_v0 }
 0x223   : > { %1511 = vmatprep.subr.bf16.mxu0 %v1902_v0 }
 0x229   : > { %1502 = vmatmul.mubr.msk.bf16.vlgmr.msra.gmra.mrb[16].mxu0 %vm656_vm2, %v990_v32 }
 0x22a   : > { %1515 = vmatprep.mubr.msk.bf16.mxu0 %vm1903_vm0, %v1902_v0 }
 0x27a   : > { %v697_v35 = vpop.f32.mrb[4].mxu0 }
 0x27b   : > { %v698_v36 = vadd.f32 %v697_v35, %v516_v34  ;;  %v1467_v37 = vpop.f32.mrb[5].mxu0 }
 0x27c   : > { %v700_v38 = vpop.f32.mrb[6].mxu0 }
 0x27d   : > { %v703_v39 = vmul.f32 0.17677669, %v698_v36  ;;  %v1468_v40 = vpop.f32.mrb[7].mxu0 }
 0x27f   : > { %v704_v41 = vsel %vm656_vm2, %v703_v39, -inf }
 0x280   : > { %705 = vmax.xlane.f32.xlu0 %v704_v41 }
 0x2ec   : > { %v811_v42 = vpop.f32.mrb[8].mxu0 }
 0x2ed   : > { %v812_v43 = vadd.f32 %v811_v42, %v516_v34  ;;  %v1479_v44 = vpop.f32.mrb[9].mxu0 }
 0x2ee   : > { %v814_v45 = vpop.f32.mrb[10].mxu0 }
 0x2ef   : > { %v817_v46 = vmul.f32 0.17677669, %v812_v43  ;;  %v1480_v47 = vpop.f32.mrb[11].mxu0 }
 0x2f1   : > { %v818_v48 = vsel %vm656_vm2, %v817_v46, -inf }
 0x2f2   : > { %819 = vmax.xlane.f32.xlu1 %v818_v48 }
 0x2f4   : > { %v922_v49 = vpop.f32.mrb[12].mxu0 }
 0x2f5   : > { %v923_v50 = vadd.f32 %v922_v49, %v516_v34  ;;  %v1491_v51 = vpop.f32.mrb[13].mxu0  ;;  %v1635_v49 = vld [vmem:[%s2437_s13] sm:$0xff]  }
 0x2f6   : > { %v925_v52 = vpop.f32.mrb[14].mxu0  ;;  %1512 = vmatpush3.bf16.msra.mxu0 %v1635_v49 }
 0x2f7   : > { %v928_v53 = vmul.f32 0.17677669, %v923_v50  ;;  %v1492_v54 = vpop.f32.mrb[15].mxu0  ;;  %1513 = vmatprep.subr.bf16.mxu0 %v1902_v0 }
 0x2f8   : > { %v1636_v54 = vld [vmem:[%s2437_s13 + $0x8] sm:$0xff]  }
 0x2f9   : > { %v929_v55 = vsel %vm656_vm2, %v928_v53, -inf }
 0x2fa   : > { %930 = vmax.xlane.f32.xlu0 %v929_v55  ;;  %1514 = vmatpush3.bf16.msra.mxu0 %v1636_v54 }
 0x2fc   : > { %v1033_v56 = vpop.f32.mrb[16].mxu0 }
 0x2fd   : > { %v1034_v57 = vadd.f32 %v1033_v56, %v516_v34  ;;  %v1503_v58 = vpop.f32.mrb[17].mxu0 }
 0x2fe   : > { %v1036_v59 = vpop.f32.mrb[18].mxu0 }
 0x2ff   : > { %v1039_v60 = vmul.f32 0.17677669, %v1034_v57  ;;  %v1504_v61 = vpop.f32.mrb[19].mxu0 }
 0x301   : > { %v1040_v62 = vsel %vm656_vm2, %v1039_v60, -inf }
 0x302   : > { %1041 = vmax.xlane.f32.xlu0 %v1040_v62 }
 0x30d   : > { %v706_v63 = vpop.xlane.xlu0 %705 }
 0x30e   : > { %v707_v1 = vsub.f32 %v703_v39, %v706_v63 }
 0x310   : > { %v708_v2 = vmul.f32 1.442695, %v707_v1 }
 0x312   : > { %1637 = vpow2.f32 %v708_v2 }
 0x31c   : > { %v1638_v3 = vpop.eup %1637 }
 0x31d   : > { %v710_v4 = vsel %vm656_vm2, %v1638_v3, 0.0 }
 0x31e   : > { %711 = vadd.xlane.f32.xlu1 %v710_v4 }
 0x32f   : > { %717 = vrot.lane.b32.xlu1 %v2259_v18, %s1907_s14 }
 0x37f   : > { %v820_v5 = vpop.xlane.xlu1 %819 }
 0x380   : > { %v821_v7 = vsub.f32 %v817_v46, %v820_v5 }
 0x382   : > { %v822_v8 = vmul.f32 1.442695, %v821_v7  ;;  %v1412_v7 = vld [vmem:[#allocation10] ss:$0 sm:$0xff] }
 0x384   : > { %1639 = vpow2.f32 %v822_v8 }
 0x387   : > { %v931_v9 = vpop.xlane.xlu0 %930 }
 0x388   : > { %v932_v10 = vsub.f32 %v928_v53, %v931_v9 }
 0x38a   : > { %v933_v11 = vmul.f32 1.442695, %v932_v10 }
 0x38c   : > { %1641 = vpow2.f32 %v933_v11 }
 0x38e   : > { %v1640_v12 = vpop.eup %1639 }
 0x38f   : > { %v1042_v13 = vpop.xlane.xlu0 %1041  ;;  %v824_v14 = vsel %vm656_vm2, %v1640_v12, 0.0 }
 0x390   : > { %v1043_v15 = vsub.f32 %v1039_v60, %v1042_v13  ;;  %825 = vadd.xlane.f32.xlu0 %v824_v14 }
 0x392   : > { %v1044_v16 = vmul.f32 1.442695, %v1043_v15 }
 0x394   : > { %1643 = vpow2.f32 %v1044_v16 }
 0x396   : > { %v1642_v17 = vpop.eup %1641 }
 0x397   : > { %v935_v19 = vsel %vm656_vm2, %v1642_v17, 0.0 }
 0x398   : > { %936 = vadd.xlane.f32.xlu1 %v935_v19 }
 0x39e   : > { %v1644_v20 = vpop.eup %1643 }
 0x39f   : > { %v1046_v21 = vsel %vm656_vm2, %v1644_v20, 0.0 }
 0x3a0   : > { %1047 = vadd.xlane.f32.xlu0 %v1046_v21 }
 0x3a9   : > { %941 = vrot.lane.b32.xlu1 %v2259_v18, %s1908_s29  ;;  %s2440_s29 = sld [smem:[#allocation25_spill]] }
 0x3ab   : > { %v712_v22 = vpop.xlane.xlu1 %711 }
 0x3ac   : > { %1645 = vrcp.f32 %v712_v22 }
 0x3ad   : > { %1052 = vrot.lane.b32.xlu1 %v2259_v18, %s1909_s10  ;;  %s1419_s10 = sshll.u32 %s2438_s9, 7 }
 0x3ae   : > { %s2340_s25 = scalar_lea.hbm %s2441_s23, %s1419_s10 }
 0x3af   : > { %v718_v23 = vpop.permute.xlu1 %717 }
 0x3b0   : > { %v724_v24 = vsel %vm722_vm3, %v718_v23, 0 }
 0x3b1   : > { %1470 = vmatpush3.bf16.msra.mxu1 %v724_v24 }
 0x3b2   : > { %1481 = vmatprep.subr.bf16.mxu1 %v1902_v0 }
 0x3b6   : > { %v1646_v25 = vpop.eup %1645  ;;  %830 = vrot.lane.b32.xlu0 %v2259_v18, %s1910_s17  ;;  %s509_s17 = scalar_lea.vmem [#allocation11], %s2211_s4  ;;  %s1914_s4 = smov [#allocation11]  }
 0x3b7   : > { %v714_v26 = vmul.f32 %v1646_v25, %v1638_v3  ;;  %s1231_s26 = sshll.u32 %s509_s17, 4  ;;  %s1803_s9 = sshll.u32 %s1914_s4, 4  ;;  %s2342_s26 = int_to_ptr.vmem [resolvable:$true] %s1231_s26  ;;  %s1804_s9 = int_to_ptr.vmem [resolvable:$false] %s1803_s9 }
 0x3b8   : > { %s1805_s2 = scalar_lea.vmem %s1804_s9, 256  ;;  %p1806_p2 = scmp.lt.s32.totalorder %s2342_s26, %s1804_s9 }
 0x3b9   : > { %v715_v27 = vpack.c.bf16 %v714_v26, %v714_v26  ;;  %v1417_v26 = vld [vmem:[%s2440_s29] ss:$0 sm:$0xff] }
 0x3bb   : > { %1472 = vmatmul.mubr.msk.bf16.vlgmr.msra.gmra.mrb[4].mxu1 %vm656_vm2, %v715_v27 }
 0x3bc   : > { %1483 = vmatprep.mubr.msk.bf16.mxu1 %vm1903_vm0, %v1902_v0 }
 0x41d   : > { %v826_v28 = vpop.xlane.xlu0 %825 }
 0x41e   : > { %1647 = vrcp.f32 %v826_v28 }
 0x425   : > { %v937_v29 = vpop.xlane.xlu1 %936 }
 0x426   : > { %1649 = vrcp.f32 %v937_v29 }
 0x428   : > { %v1648_v30 = vpop.eup %1647 }
 0x429   : > { %v828_v32 = vmul.f32 %v1648_v30, %v1640_v12  ;;  %v942_v35 = vpop.permute.xlu1 %941 }
 0x42a   : > { %v947_v37 = vsel %vm722_vm3, %v942_v35, 0 }
 0x42b   : > { %v829_v18 = vpack.c.bf16 %v828_v32, %v828_v32 }
 0x42d   : > { %v1048_v31 = vpop.xlane.xlu0 %1047  ;;  %v1053_v39 = vpop.permute.xlu1 %1052 }
 0x42e   : > { %1651 = vrcp.f32 %v1048_v31  ;;  %v1058_v42 = vsel %vm722_vm3, %v1053_v39, 0 }
 0x430   : > { %v1650_v36 = vpop.eup %1649 }
 0x431   : > { %v831_v33 = vpop.permute.xlu0 %830  ;;  %v939_v38 = vmul.f32 %v1650_v36, %v1642_v17 }
 0x432   : > { %v836_v34 = vsel %vm722_vm3, %v831_v33, 0 }
 0x433   : > { %1482 = vmatpush3.bf16.msra.mxu1 %v836_v34  ;;  %v940_v40 = vpack.c.bf16 %v939_v38, %v939_v38 }
 0x434   : > { %1493 = vmatprep.subr.bf16.mxu1 %v1902_v0 }
 0x436   : > { %1484 = vmatmul.mubr.msk.bf16.vlgmr.msra.gmra.mrb[8].mxu1 %vm656_vm2, %v829_v18 }
 0x437   : > { %1494 = vmatpush3.bf16.msra.mxu1 %v947_v37  ;;  %1495 = vmatprep.mubr.msk.bf16.mxu1 %vm1903_vm0, %v1902_v0 }
 0x438   : > { %1505 = vmatprep.subr.bf16.mxu1 %v1902_v0  ;;  %v1652_v41 = vpop.eup %1651 }
 0x439   : > { %v1050_v43 = vmul.f32 %v1652_v41, %v1644_v20 }
 0x43b   : > { %v1051_v44 = vpack.c.bf16 %v1050_v43, %v1050_v43 }
 0x43e   : > { %1496 = vmatmul.mubr.msk.bf16.vlgmr.msra.gmra.mrb[12].mxu1 %vm656_vm2, %v940_v40 }
 0x43f   : > { %1506 = vmatpush3.bf16.msra.mxu1 %v1058_v42  ;;  %1507 = vmatprep.mubr.msk.bf16.mxu1 %vm1903_vm0, %v1902_v0 }
 0x446   : > { %1508 = vmatmul.mubr.msk.bf16.vlgmr.msra.gmra.mrb[16].mxu1 %vm656_vm2, %v1051_v44 }
 0x48e   : > { %v760_v45 = vpop.f32.mrb[4].mxu1 }
 0x48f   : > { %v1473_v46 = vpop.f32.mrb[5].mxu1 }
 0x490   : > { %v763_v47 = vpop.f32.mrb[6].mxu1 }
 0x491   : > { %v1474_v48 = vpop.f32.mrb[7].mxu1 }
 0x509   : > { %v872_v50 = vpop.f32.mrb[8].mxu1 }
 0x50a   : > { %1101 = vrot.lane.b32.xlu0 %v872_v50, %s1911_s11  ;;  %v1485_v51 = vpop.f32.mrb[9].mxu1 }
 0x50b   : > { %v875_v52 = vpop.f32.mrb[10].mxu1 }
 0x50c   : > { %v1486_v53 = vpop.f32.mrb[11].mxu1 }
 0x511   : > { %v983_v55 = vpop.f32.mrb[12].mxu1 }
 0x512   : > { %1105 = vrot.lane.b32.xlu1 %v983_v55, %s1912_s16  ;;  %v1497_v56 = vpop.f32.mrb[13].mxu1  ;;  %s1217_s16 = scalar_lea.sflag [#allocation4], %s2208_s28 }
 0x513   : > { %v986_v57 = vpop.f32.mrb[14].mxu1 }
 0x514   : > { %v1498_v58 = vpop.f32.mrb[15].mxu1 }
 0x519   : > { %v1094_v59 = vpop.f32.mrb[16].mxu1 }
 0x51a   : > { %1109 = vrot.lane.b32.xlu0 %v1094_v59, %s1913_s12  ;;  %v1509_v0 = vpop.f32.mrb[17].mxu1  ;;  %s1799_s12 = scalar_lea.vmem %s2342_s26, 128 }
 0x51b   : > { %v1097_v60 = vpop.f32.mrb[18].mxu1  ;;  %p1800_p0 = scmp.ne.s32.totalorder %s2342_s26, %s1799_s12  ;;  %p1807_p13 = scmp.lt.s32.totalorder %s1805_s2, %s1799_s12 }
 0x51c   : > { %v1510_v61 = vpop.f32.mrb[19].mxu1 }
 0x51d   : > { %p1801_p4 = pnand %p1800_p0, %p2442_p1  ;;  %p1808_p3 = por %p1807_p13, %p1806_p2 }
 0x51f   : > { %p1802_p8 = pneg %p1801_p4 }
 0x521   : > { %p1809_p5 = pnand %p1808_p3, %p1802_p8 }
 0x57c   : > { %v1102_v62 = vpop.permute.xlu0 %1101 }
 0x57d   : > { %v1112_v1 = vsel %vm656_vm2, %v760_v45, %v1102_v62 }
 0x584   : > { %v1106_v63 = vpop.permute.xlu1 %1105 }
 0x585   : > { %v1114_v2 = vsel %vm1113_vm4, %v1112_v1, %v1106_v63 }
 0x58c   : > { %v1110_v3 = vpop.permute.xlu0 %1109 }
 0x58d   : > { %v1116_v4 = vsel %vm1115_vm5, %v1114_v2, %v1110_v3 }
 0x58e   : > { %v1117_v5 = vpack.c.bf16 %v1116_v4, %v1116_v4 }
 0x590   : > { %1516 = vmatmul.mubr.msk.bf16.vlgmr.msra.gmra.mrb[20].mxu0 %vm543_vm1, %v1117_v5 }
 0x663   : > { %v1178_v8 = vpop.f32.mrb[20].mxu0 }
 0x664   : > { %v1179_v9 = vadd.f32 %v1412_v7, %v1178_v8  ;;  %v1517_v10 = vpop.f32.mrb[21].mxu0 }
 0x665   : > { %v1181_v11 = vpop.f32.mrb[22].mxu0 }
 0x666   : > { %v1518_v12 = vpop.f32.mrb[23].mxu0  ;;  %v1184_v13 = vadd.f32 %v1179_v9, %v2241_v6  ;;  %v1416_v6 = vld [vmem:[%s2439_s7] ss:$0 sm:$0xff] }
 0x668   : > { %v1185_v14 = vsel %vm543_vm1, %v1184_v13, 0.0 }
 0x669   : > { %1186 = vadd.xlane.f32.xlu1 %v1185_v14 }
 0x6f6   : > { %v1187_v15 = vpop.xlane.xlu1 %1186 }
 0x6f7   : > { %v1189_v16 = vmul.f32 0.03125, %v1187_v15 }
 0x6f9   : > { %v1190_v17 = vsub.f32 %v1184_v13, %v1189_v16 }
 0x6fb   : > { %v1191_v19 = vmul.f32 %v1190_v17, %v1190_v17 }
 0x6fd   : > { %v1192_v20 = vsel %vm543_vm1, %v1191_v19, 0.0 }
 0x6fe   : > { %1193 = vadd.xlane.f32.xlu0 %v1192_v20 }
 0x78b   : > { %v1194_v21 = vpop.xlane.xlu0 %1193 }
 0x78c   : > { %v1195_v22 = vmul.f32 0.03125, %v1194_v21 }
 0x78e   : > { %v1196_v23 = vadd.f32 1e-05, %v1195_v22 }
 0x790   : > { %1653 = vrsqrt.f32 %v1196_v23 }
 0x79a   : > { %v1654_v24 = vpop.eup %1653 }
 0x79b   : > { %v1198_v25 = vmul.f32 %v1654_v24, %v1190_v17 }
 0x79d   : > { %v1206_v27 = vmul.f32 %v1416_v6, %v1198_v25 }
 0x79f   : > { %v1214_v28 = vadd.f32 %v1417_v26, %v1206_v27 }
 0x7a1   : > { %1215 = vst.msk [vmem:[%s509_s17] sm:$0xff] %vm543_vm1, %v1214_v28 }
 0x7a2   : > { %1812 = shalt.err (!%p1809_p5)
}
 0x7a3   : > { %s1813_s28 = scalar_lea.hbm %s2340_s25, 128  ;;  %s1817_s15 = scalar_lea.hbm %s2441_s23, 256 }
 0x7a4   : > { %p1814_p6 = scmp.ne.s32.totalorder %s2340_s25, %s1813_s28  ;;  %p1818_p12 = scmp.lt.u32.totalorder %s2340_s25, %s2441_s23 }
 0x7a5   : > { %p1819_p11 = scmp.lt.u32.totalorder %s1817_s15, %s1813_s28  ;;  %p1821_p0 = scmp.lt.u32.totalorder %s1813_s28, %s2340_s25 }
 0x7a6   : > { %p1815_p10 = pnand %p1814_p6, %p2442_p1 }
 0x7a7   : > { %p1820_p9 = por %p1819_p11, %p1818_p12 }
 0x7a8   : > { %p1816_p7 = pneg %p1815_p10 }
 0x7a9   : > { %p1822_p4 = por %p1821_p0, %p1820_p9 }
 0x7ab   : > { %p1823_p8 = pnand %p1822_p4, %p1816_p7 }
 0x7ad   : > { %1826 = shalt.err (!%p1823_p8)
}
 0x7ae   : > { %1535 = dma.vmem_to_hbm [thread:$0]  (%p2442_p1), %s2342_s26, 128, %s2340_s25, %s1217_s16  }
 0x7af PF: > { %s2443_s10 = sld [smem:[#allocation17_spill]]  ;;  %s2444_s17 = sld [smem:[#allocation19_spill]] }
 0x7b0   : > { %p2446_p13 = scmp.ge.s32.totalorder %s1893_s22, 2 }
 0x7b5   : > { %s1243_s27 = sand.u32 1, %s2443_s10   ;;  %p2445_p2 = scmp.ne.s32.totalorder %s2444_s17, 0 }
 0x7b6   : > { %s1244_s11 = scalar_lea.sflag [#allocation4], %s1243_s27 }
 0x7b7   : > { %p1555_p3 = pnand %p2446_p13, %p2445_p2 }
 0x7b9   : > { %1868 = dma.done.wait (!%p1555_p3), %s1244_s11, 128  }
 0x7ba   : > { %1870 = vsyncadd (!%p1555_p3), %s1244_s11, 4294967168  ;;  %s31_s22 = sadd.s32 1, %s1893_s22   ;;  %s2447_s17 = smov %s1877_s18 }
 0x7bb   : > { %p28_p5 = scmp.ge.s32.totalorder %s31_s22, 4   ;;  %s2448_s18 = smov %s1881_s19 }
 0x7bc   : > { %s2449_s19 = smov %s2136_s24  ;;  %s2450_s20 = smov %s1889_s21 }
 0x7bd   : > { %s2451_s21 = smov %s2453_s6  ;;  %30 = sbr.rel (!%p28_p5) target bundleno = 17 (0x11), region = 137 }
 0x7c4   :  { %1249 = vsyncpa [#allocation3], 1 }
 0x7c5   :  { %1251 = vsyncpa [#allocation3 + $0x1], 1 }
 0x7c6   :  { %1252 = vsyncpa [#allocation6], 1 }
 0x7c7   :  { %1254 = vsyncpa [#allocation6 + $0x1], 1 }
 0x7c8   :  { %1255 = vsyncpa [#allocation9], 1 }
 0x7c9   :  { %1256 = vsyncpa [#allocation4], 1 }
 0x7ca   :  { %1258 = vsyncpa [#allocation4 + $0x1], 1 }

</bundles_post_ra>
